<compile_context>
chip_gen: v7x
topology: tpu7x:2x2x1
jax: 0.10.0
libtpu: 0.0.40
codegen_flags: <defaults>
</compile_context>

<pallas_src>
import math

import jax
import jax.numpy as jnp
from jax.experimental import pallas as pl
from jax.experimental.pallas import tpu as pltpu

# Module hyper-parameters (small, consistent with the forward pass).
D_MODEL = 32
N_HEADS = 4
DFF = 64
HEAD_DIM = D_MODEL // N_HEADS
EPS = 1e-5                      # torch nn.LayerNorm default eps
SCALE = 1.0 / math.sqrt(HEAD_DIM)

# ---------------------------------------------------------------------------
# Packed parameter layout.
#   w_slab : (32, 320)  all d_model-input weights concatenated on the output
#            dim; chunk boundaries never cross a 128-lane tile.
#   ff_w2  : (64, 32)   second FF weight (different input dim -> own slab).
#   b_slab : (16, 128)  one bias / LayerNorm vector per row, zero-padded.
# ---------------------------------------------------------------------------
_W_SA_QKV = (0, 96)       # [sa_wq | sa_wk | sa_wv]
_W_SA_O = (96, 128)       # sa_wo
_W_RA_QK = (128, 192)     # [ra_wq | ra_wk]
_W_RA_V = (192, 224)      # ra_wv
_W_RA_O = (224, 256)      # ra_wo
_W_FF1 = (256, 320)       # ff_w1

(_B_LN1_G, _B_LN1_B, _B_LN2_G, _B_LN2_B,
 _B_SA_QKV, _B_SA_O, _B_RA_QK, _B_RA_V, _B_RA_O,
 _B_FF1, _B_FF2) = range(11)
B_SLAB_ROWS = 16
B_SLAB_COLS = 128


def _pack_params(params):
    w_slab = jnp.concatenate([
        params["sa_wq"], params["sa_wk"], params["sa_wv"],   # 0:96
        params["sa_wo"],                                     # 96:128
        params["ra_wq"], params["ra_wk"],                    # 128:192
        params["ra_wv"],                                     # 192:224
        params["ra_wo"],                                     # 224:256
        params["ff_w1"],                                     # 256:320
    ], axis=1)

    def row(*vs):
        v = jnp.concatenate([jnp.reshape(a, (1, -1)) for a in vs], axis=1)
        return jnp.pad(v, ((0, 0), (0, B_SLAB_COLS - v.shape[1])))

    b_slab = jnp.concatenate([
        row(params["ln1_g"]), row(params["ln1_b"]),
        row(params["ln2_g"]), row(params["ln2_b"]),
        row(params["sa_bq"], params["sa_bk"], params["sa_bv"]),
        row(params["sa_bo"]),
        row(params["ra_bq"], params["ra_bk"]),
        row(params["ra_bv"]),
        row(params["ra_bo"]),
        row(params["ff_b1"]),
        row(params["ff_b2"]),
    ], axis=0)
    b_slab = jnp.pad(b_slab, ((0, B_SLAB_ROWS - b_slab.shape[0]), (0, 0)))
    return w_slab, params["ff_w2"], b_slab


def _choose_block_b(batch):
    """Batch tile: TB*N >= 128 rows when possible, minimal zero-padding,
    and >= 2 grid steps when it is free (v7x has 2 TensorCores)."""
    if batch < 8:
        return batch, batch          # single full-batch block
    best_key, best_tb, best_bp = None, None, None
    for tb in (256, 128, 64, 32, 16, 8):
        padded = -(-batch // tb) * tb
        steps = padded // tb
        key = (padded, 0 if steps >= 2 else 1, -tb)
        if best_key is None or key < best_key:
            best_key, best_tb, best_bp = key, tb, padded
    return best_tb, best_bp


def _make_kernel(tb, n):
    m = tb * n

    def kernel(x_ref, s_ref, w_ref, w2_ref, b_ref, o_ref):

        def bias(row, width):                    # (1, width) bias / LN vector
            return b_ref[row:row + 1, 0:width]

        def layer_norm(t, g, beta):
            mu = jnp.mean(t, axis=-1, keepdims=True)
            var = jnp.mean(jnp.square(t - mu), axis=-1, keepdims=True)
            return (t - mu) * jax.lax.rsqrt(var + EPS) * g + beta

        def attention(q2d, k2d, v2d, wo, bo):
            # q2d/k2d/v2d: (m, D).  Per-head math is TB-batched; the output
            # projection is folded per head, so no lane-axis concatenate.
            out = None
            for h in range(N_HEADS):
                sl = slice(h * HEAD_DIM, (h + 1) * HEAD_DIM)
                qh = q2d[:, sl].reshape(tb, n, HEAD_DIM)
                kh = k2d[:, sl].reshape(tb, n, HEAD_DIM)
                vh = v2d[:, sl].reshape(tb, n, HEAD_DIM)
                sc = jnp.einsum("bqd,bkd->bqk", qh, kh,
                                preferred_element_type=jnp.float32) * SCALE
                sc = sc - jnp.max(sc, axis=-1, keepdims=True)
                e = jnp.exp(sc)
                p = e * pl.reciprocal(jnp.sum(e, axis=-1, keepdims=True),
                                      approx=True)
                oh = jnp.einsum("bqk,bkd->bqd", p, vh,
                                preferred_element_type=jnp.float32)
                contrib = jnp.dot(oh.reshape(m, HEAD_DIM), wo[sl, :],
                                  preferred_element_type=jnp.float32)
                out = contrib if out is None else out + contrib
            return out + bo

        ln1_g = bias(_B_LN1_G, D_MODEL)
        ln1_b = bias(_B_LN1_B, D_MODEL)
        ln2_g = bias(_B_LN2_G, D_MODEL)
        ln2_b = bias(_B_LN2_B, D_MODEL)

        # Flatten (TB, N, D) -> (TB*N, D): zero-cost leading-dim merge.
        x = x_ref[...].reshape(m, D_MODEL)
        s = s_ref[...].reshape(m, D_MODEL)

        # --- self-attention on s (pre-norm, shares norm1), fused QKV -------
        s_n = layer_norm(s, ln1_g, ln1_b)
        qkv = (jnp.dot(s_n, w_ref[:, _W_SA_QKV[0]:_W_SA_QKV[1]],
                       preferred_element_type=jnp.float32)
               + bias(_B_SA_QKV, 3 * D_MODEL))
        s = s + attention(qkv[:, 0:D_MODEL],
                          qkv[:, D_MODEL:2 * D_MODEL],
                          qkv[:, 2 * D_MODEL:3 * D_MODEL],
                          w_ref[:, _W_SA_O[0]:_W_SA_O[1]],
                          bias(_B_SA_O, D_MODEL))

        # --- relational cross-attention: q,k from norm1(x), value = s ------
        x_n = layer_norm(x, ln1_g, ln1_b)
        qk = (jnp.dot(x_n, w_ref[:, _W_RA_QK[0]:_W_RA_QK[1]],
                      preferred_element_type=jnp.float32)
              + bias(_B_RA_QK, 2 * D_MODEL))
        v = (jnp.dot(s, w_ref[:, _W_RA_V[0]:_W_RA_V[1]],
                     preferred_element_type=jnp.float32)
             + bias(_B_RA_V, D_MODEL))
        x = x + attention(qk[:, 0:D_MODEL], qk[:, D_MODEL:2 * D_MODEL], v,
                          w_ref[:, _W_RA_O[0]:_W_RA_O[1]],
                          bias(_B_RA_O, D_MODEL))

        # --- pre-norm feed-forward block with relu -------------------------
        x_n2 = layer_norm(x, ln2_g, ln2_b)
        h1 = jnp.maximum(
            jnp.dot(x_n2, w_ref[:, _W_FF1[0]:_W_FF1[1]],
                    preferred_element_type=jnp.float32) + bias(_B_FF1, DFF),
            0.0)
        ff = (jnp.dot(h1, w2_ref[...], preferred_element_type=jnp.float32)
              + bias(_B_FF2, D_MODEL))
        x = x + ff

        o_ref[...] = x.reshape(tb, n, D_MODEL).astype(o_ref.dtype)

    return kernel


@jax.jit
def abstractor_module_layer(x, s, params):
    """x, s: (B, N, D_MODEL) float32.  Returns (B, N, D_MODEL)."""
    B, N, D = x.shape
    assert D == D_MODEL and s.shape == x.shape

    tb, bp = _choose_block_b(B)
    if bp != B:                      # zero-pad ragged batch to a TB multiple
        pad = ((0, bp - B), (0, 0), (0, 0))
        x = jnp.pad(x, pad)
        s = jnp.pad(s, pad)

    w_slab, ff_w2, b_slab = _pack_params(params)

    act_spec = pl.BlockSpec((tb, N, D), lambda b: (b, 0, 0))

    def full2d(arr):                 # whole (small) parameter slab, resident
        return pl.BlockSpec(arr.shape, lambda b: (0, 0))

    out = pl.pallas_call(
        _make_kernel(tb, N),
        out_shape=jax.ShapeDtypeStruct((bp, N, D), x.dtype),
        grid=(bp // tb,),
        in_specs=[act_spec, act_spec,
                  full2d(w_slab), full2d(ff_w2), full2d(b_slab)],
        out_specs=act_spec,
        compiler_params=pltpu.CompilerParams(
            dimension_semantics=("parallel",)),
    )(x, s, w_slab, ff_w2, b_slab)
    return out[:B]


def init_params(key):
    """Deterministic synthetic parameters (torch-Linear-style uniform init)."""
    params = {
        "ln1_g": jnp.ones((1, D_MODEL), jnp.float32),
        "ln1_b": jnp.zeros((1, D_MODEL), jnp.float32),
        "ln2_g": jnp.ones((1, D_MODEL), jnp.float32),
        "ln2_b": jnp.zeros((1, D_MODEL), jnp.float32),
    }

    def linear(k, fan_in, fan_out):
        kw, kb = jax.random.split(k)
        bound = 1.0 / math.sqrt(fan_in)
        w = jax.random.uniform(kw, (fan_in, fan_out), jnp.float32, -bound, bound)
        b = jax.random.uniform(kb, (1, fan_out), jnp.float32, -bound, bound)
        return w, b

    keys = jax.random.split(key, 10)
    for prefix, ks in (("sa", keys[0:4]), ("ra", keys[4:8])):
        for name, k in zip(("q", "k", "v", "o"), ks):
            w, b = linear(k, D_MODEL, D_MODEL)
            params[f"{prefix}_w{name}"] = w
            params[f"{prefix}_b{name}"] = b
    params["ff_w1"], params["ff_b1"] = linear(keys[8], D_MODEL, DFF)
    params["ff_w2"], params["ff_b2"] = linear(keys[9], DFF, D_MODEL)
    return params


def reference(x, s, params):
    """Independent plain-JAX reference mirroring the torch module."""
    def ln(t, g, b):
        mu = jnp.mean(t, axis=-1, keepdims=True)
        var = jnp.mean(jnp.square(t - mu), axis=-1, keepdims=True)
        return (t - mu) / jnp.sqrt(var + EPS) * g + b

    def mha(q_in, k_in, v_in, p, pre):
        q = q_in @ p[f"{pre}_wq"] + p[f"{pre}_bq"]
        k = k_in @ p[f"{pre}_wk"] + p[f"{pre}_bk"]
        v = v_in @ p[f"{pre}_wv"] + p[f"{pre}_bv"]
        outs = []
        for h in range(N_HEADS):
            sl = slice(h * HEAD_DIM, (h + 1) * HEAD_DIM)
            sc = (q[:, sl] @ k[:, sl].T) * SCALE
            outs.append(jax.nn.softmax(sc, axis=-1) @ v[:, sl])
        o = jnp.concatenate(outs, axis=-1)
        return o @ p[f"{pre}_wo"] + p[f"{pre}_bo"]

    def one(xb, sb):
        s_ = ln(sb, params["ln1_g"], params["ln1_b"])
        sb = sb + mha(s_, s_, s_, params, "sa")
        x_ = ln(xb, params["ln1_g"], params["ln1_b"])
        xb = xb + mha(x_, x_, sb, params, "ra")
        x2 = ln(xb, params["ln2_g"], params["ln2_b"])
        hh = jax.nn.relu(x2 @ params["ff_w1"] + params["ff_b1"])
        return xb + hh @ params["ff_w2"] + params["ff_b2"]

    return jax.vmap(one)(x, s)


if __name__ == "__main__":
    key = jax.random.PRNGKey(0)
    kx, ks, kp = jax.random.split(key, 3)
    params = init_params(kp)

    # Small shapes implied by the module: batch=2, seq=8, d_model=32.
    B, N = 2, 8
    x = jax.random.normal(kx, (B, N, D_MODEL), dtype=jnp.float32)
    s = jax.random.normal(ks, (B, N, D_MODEL), dtype=jnp.float32)

    out = jax.block_until_ready(abstractor_module_layer(x, s, params))
    ref = jax.block_until_ready(reference(x, s, params))
    assert out.shape == (B, N, D_MODEL)
    assert bool(jnp.all(jnp.isfinite(out)))
    if not jnp.allclose(out, ref, atol=1e-2, rtol=1e-2):
        raise AssertionError("Pallas output does not match JAX reference (B=2)")

    # Second check exercising the batched multi-step grid path
    # (TB=8 -> 64 rows per MXU call, 3 grid steps, zero-padded ragged batch).
    B2 = 18
    kx2, ks2 = jax.random.split(jax.random.PRNGKey(1))
    x2 = jax.random.normal(kx2, (B2, N, D_MODEL), dtype=jnp.float32)
    s2 = jax.random.normal(ks2, (B2, N, D_MODEL), dtype=jnp.float32)
    out2 = jax.block_until_ready(abstractor_module_layer(x2, s2, params))
    ref2 = jax.block_until_ready(reference(x2, s2, params))
    if not jnp.allclose(out2, ref2, atol=1e-2, rtol=1e-2):
        raise AssertionError("Pallas output does not match JAX reference (B=18)")

    print("KERNEL_OK")
</pallas_src>

<mosaic_0001>
module attributes {stable_mosaic.version = 11 : i64} {
  func.func @kernel(%arg0: i32, %arg1: memref<2x8x32xf32, #tpu.memory_space<vmem>>, %arg2: memref<2x8x32xf32, #tpu.memory_space<vmem>>, %arg3: memref<32x320xf32, #tpu.memory_space<vmem>>, %arg4: memref<64x32xf32, #tpu.memory_space<vmem>>, %arg5: memref<16x128xf32, #tpu.memory_space<vmem>>, %arg6: memref<2x8x32xf32, #tpu.memory_space<vmem>>) attributes {dimension_semantics = [#tpu.dimension_semantics<parallel>], iteration_bounds = array<i64: 1>, scalar_prefetch = 0 : i64, scratch_operands = 0 : i64, tpu.core_type = #tpu.core_type<tc>, window_params = [{transform_indices = @transform_0, window_bounds = array<i64: 2, 8, 32>}, {transform_indices = @transform_1, window_bounds = array<i64: 2, 8, 32>}, {pipeline_mode = #tpu.pipeline_mode<synchronous>, transform_indices = @transform_2, window_bounds = array<i64: 32, 320>}, {pipeline_mode = #tpu.pipeline_mode<synchronous>, transform_indices = @transform_3, window_bounds = array<i64: 64, 32>}, {pipeline_mode = #tpu.pipeline_mode<synchronous>, transform_indices = @transform_4, window_bounds = array<i64: 16, 128>}, {transform_indices = @transform_5, window_bounds = array<i64: 2, 8, 32>}]} {
    %c0 = arith.constant 0 : index
    %c0_0 = arith.constant 0 : index
    %0 = vector.load %arg5[%c0, %c0_0] : memref<16x128xf32, #tpu.memory_space<vmem>>, vector<1x32xf32>
    %c1 = arith.constant 1 : index
    %c0_1 = arith.constant 0 : index
    %1 = vector.load %arg5[%c1, %c0_1] : memref<16x128xf32, #tpu.memory_space<vmem>>, vector<1x32xf32>
    %c2 = arith.constant 2 : index
    %c0_2 = arith.constant 0 : index
    %2 = vector.load %arg5[%c2, %c0_2] : memref<16x128xf32, #tpu.memory_space<vmem>>, vector<1x32xf32>
    %c3 = arith.constant 3 : index
    %c0_3 = arith.constant 0 : index
    %3 = vector.load %arg5[%c3, %c0_3] : memref<16x128xf32, #tpu.memory_space<vmem>>, vector<1x32xf32>
    %c0_4 = arith.constant 0 : index
    %c0_5 = arith.constant 0 : index
    %c0_6 = arith.constant 0 : index
    %4 = vector.load %arg1[%c0_4, %c0_5, %c0_6] : memref<2x8x32xf32, #tpu.memory_space<vmem>>, vector<2x8x32xf32>
    %5 = vector.shape_cast %4 : vector<2x8x32xf32> to vector<16x32xf32>
    %c0_7 = arith.constant 0 : index
    %c0_8 = arith.constant 0 : index
    %c0_9 = arith.constant 0 : index
    %6 = vector.load %arg2[%c0_7, %c0_8, %c0_9] : memref<2x8x32xf32, #tpu.memory_space<vmem>>, vector<2x8x32xf32>
    %7 = vector.shape_cast %6 : vector<2x8x32xf32> to vector<16x32xf32>
    %cst = arith.constant dense<0.000000e+00> : vector<16xf32>
    %8 = vector.multi_reduction <add>, %7, %cst [1] : vector<16x32xf32> to vector<16xf32>
    %9 = vector.shape_cast %8 : vector<16xf32> to vector<16x1xf32>
    %cst_10 = arith.constant 3.200000e+01 : f32
    %10 = vector.broadcast %cst_10 : f32 to vector<16x1xf32>
    %11 = arith.divf %9, %10 : vector<16x1xf32>
    %12 = vector.broadcast %11 : vector<16x1xf32> to vector<16x32xf32>
    %13 = arith.subf %7, %12 : vector<16x32xf32>
    %14 = arith.mulf %13, %13 : vector<16x32xf32>
    %cst_11 = arith.constant dense<0.000000e+00> : vector<16xf32>
    %15 = vector.multi_reduction <add>, %14, %cst_11 [1] : vector<16x32xf32> to vector<16xf32>
    %16 = vector.shape_cast %15 : vector<16xf32> to vector<16x1xf32>
    %cst_12 = arith.constant 3.200000e+01 : f32
    %17 = vector.broadcast %cst_12 : f32 to vector<16x1xf32>
    %18 = arith.divf %16, %17 : vector<16x1xf32>
    %19 = vector.broadcast %11 : vector<16x1xf32> to vector<16x32xf32>
    %20 = arith.subf %7, %19 : vector<16x32xf32>
    %cst_13 = arith.constant 9.99999974E-6 : f32
    %21 = vector.broadcast %cst_13 : f32 to vector<16x1xf32>
    %22 = arith.addf %18, %21 : vector<16x1xf32>
    %23 = math.rsqrt %22 : vector<16x1xf32>
    %24 = vector.broadcast %23 : vector<16x1xf32> to vector<16x32xf32>
    %25 = arith.mulf %20, %24 : vector<16x32xf32>
    %26 = vector.broadcast %0 : vector<1x32xf32> to vector<16x32xf32>
    %27 = arith.mulf %25, %26 : vector<16x32xf32>
    %28 = vector.broadcast %1 : vector<1x32xf32> to vector<16x32xf32>
    %29 = arith.addf %27, %28 : vector<16x32xf32>
    %c0_14 = arith.constant 0 : index
    %c0_15 = arith.constant 0 : index
    %30 = vector.load %arg3[%c0_14, %c0_15] : memref<32x320xf32, #tpu.memory_space<vmem>>, vector<32x96xf32>
    %cst_16 = arith.constant dense<0.000000e+00> : vector<16x96xf32>
    %31 = tpu.matmul %29, %30, %cst_16 {dimension_numbers = #tpu.dot_dimension_numbers<[1], [0], [0], [1], [0, 0, 1, 1], [], []>} : vector<16x32xf32>, vector<32x96xf32>, vector<16x96xf32> -> vector<16x96xf32>
    %c4 = arith.constant 4 : index
    %c0_17 = arith.constant 0 : index
    %32 = vector.load %arg5[%c4, %c0_17] : memref<16x128xf32, #tpu.memory_space<vmem>>, vector<1x96xf32>
    %33 = vector.broadcast %32 : vector<1x96xf32> to vector<16x96xf32>
    %34 = arith.addf %31, %33 : vector<16x96xf32>
    %35 = vector.extract_strided_slice %34 {offsets = [0, 0], sizes = [16, 32], strides = [1, 1]} : vector<16x96xf32> to vector<16x32xf32>
    %36 = vector.extract_strided_slice %34 {offsets = [0, 32], sizes = [16, 32], strides = [1, 1]} : vector<16x96xf32> to vector<16x32xf32>
    %37 = vector.extract_strided_slice %34 {offsets = [0, 64], sizes = [16, 32], strides = [1, 1]} : vector<16x96xf32> to vector<16x32xf32>
    %c0_18 = arith.constant 0 : index
    %c96 = arith.constant 96 : index
    %38 = vector.load %arg3[%c0_18, %c96] : memref<32x320xf32, #tpu.memory_space<vmem>>, vector<32x32xf32>
    %c5 = arith.constant 5 : index
    %c0_19 = arith.constant 0 : index
    %39 = vector.load %arg5[%c5, %c0_19] : memref<16x128xf32, #tpu.memory_space<vmem>>, vector<1x32xf32>
    %40 = vector.extract_strided_slice %35 {offsets = [0, 0], sizes = [16, 8], strides = [1, 1]} : vector<16x32xf32> to vector<16x8xf32>
    %41 = vector.shape_cast %40 : vector<16x8xf32> to vector<2x8x8xf32>
    %42 = vector.extract_strided_slice %36 {offsets = [0, 0], sizes = [16, 8], strides = [1, 1]} : vector<16x32xf32> to vector<16x8xf32>
    %43 = vector.shape_cast %42 : vector<16x8xf32> to vector<2x8x8xf32>
    %44 = vector.extract_strided_slice %37 {offsets = [0, 0], sizes = [16, 8], strides = [1, 1]} : vector<16x32xf32> to vector<16x8xf32>
    %45 = vector.shape_cast %44 : vector<16x8xf32> to vector<2x8x8xf32>
    "tpu.trace_start"() <{level = 10 : i32, message = "bqd,bkd->bqk"}> : () -> ()
    %cst_20 = arith.constant dense<0.000000e+00> : vector<2x8x8xf32>
    %46 = tpu.matmul %41, %43, %cst_20 {dimension_numbers = #tpu.dot_dimension_numbers<[2], [2], [1], [1], [0, 0, 0, 1, 1, 1], [0], [0]>} : vector<2x8x8xf32>, vector<2x8x8xf32>, vector<2x8x8xf32> -> vector<2x8x8xf32>
    "tpu.trace_stop"() : () -> ()
    %cst_21 = arith.constant 0.353553385 : f32
    %47 = vector.broadcast %cst_21 : f32 to vector<2x8x8xf32>
    %48 = arith.mulf %46, %47 : vector<2x8x8xf32>
    %cst_22 = arith.constant dense<0xFF800000> : vector<2x8xf32>
    %49 = vector.multi_reduction <maximumf>, %48, %cst_22 [2] : vector<2x8x8xf32> to vector<2x8xf32>
    %50 = vector.shape_cast %49 : vector<2x8xf32> to vector<2x8x1xf32>
    %51 = vector.broadcast %50 : vector<2x8x1xf32> to vector<2x8x8xf32>
    %52 = arith.subf %48, %51 : vector<2x8x8xf32>
    %53 = math.exp %52 : vector<2x8x8xf32>
    %cst_23 = arith.constant dense<0.000000e+00> : vector<2x8xf32>
    %54 = vector.multi_reduction <add>, %53, %cst_23 [2] : vector<2x8x8xf32> to vector<2x8xf32>
    %55 = vector.shape_cast %54 : vector<2x8xf32> to vector<2x8x1xf32>
    %56 = tpu.reciprocal %55 {approx = true} : vector<2x8x1xf32> -> vector<2x8x1xf32>
    %57 = vector.broadcast %56 : vector<2x8x1xf32> to vector<2x8x8xf32>
    %58 = arith.mulf %53, %57 : vector<2x8x8xf32>
    "tpu.trace_start"() <{level = 10 : i32, message = "bqk,bkd->bqd"}> : () -> ()
    %cst_24 = arith.constant dense<0.000000e+00> : vector<2x8x8xf32>
    %59 = tpu.matmul %58, %45, %cst_24 {dimension_numbers = #tpu.dot_dimension_numbers<[2], [1], [1], [2], [0, 0, 0, 1, 1, 2], [0], [0]>} : vector<2x8x8xf32>, vector<2x8x8xf32>, vector<2x8x8xf32> -> vector<2x8x8xf32>
    "tpu.trace_stop"() : () -> ()
    %60 = vector.shape_cast %59 : vector<2x8x8xf32> to vector<16x8xf32>
    %61 = vector.extract_strided_slice %38 {offsets = [0, 0], sizes = [8, 32], strides = [1, 1]} : vector<32x32xf32> to vector<8x32xf32>
    %cst_25 = arith.constant dense<0.000000e+00> : vector<16x32xf32>
    %62 = tpu.matmul %60, %61, %cst_25 {dimension_numbers = #tpu.dot_dimension_numbers<[1], [0], [0], [1], [0, 0, 1, 1], [], []>} : vector<16x8xf32>, vector<8x32xf32>, vector<16x32xf32> -> vector<16x32xf32>
    %63 = vector.extract_strided_slice %35 {offsets = [0, 8], sizes = [16, 8], strides = [1, 1]} : vector<16x32xf32> to vector<16x8xf32>
    %64 = vector.shape_cast %63 : vector<16x8xf32> to vector<2x8x8xf32>
    %65 = vector.extract_strided_slice %36 {offsets = [0, 8], sizes = [16, 8], strides = [1, 1]} : vector<16x32xf32> to vector<16x8xf32>
    %66 = vector.shape_cast %65 : vector<16x8xf32> to vector<2x8x8xf32>
    %67 = vector.extract_strided_slice %37 {offsets = [0, 8], sizes = [16, 8], strides = [1, 1]} : vector<16x32xf32> to vector<16x8xf32>
    %68 = vector.shape_cast %67 : vector<16x8xf32> to vector<2x8x8xf32>
    "tpu.trace_start"() <{level = 10 : i32, message = "bqd,bkd->bqk"}> : () -> ()
    %cst_26 = arith.constant dense<0.000000e+00> : vector<2x8x8xf32>
    %69 = tpu.matmul %64, %66, %cst_26 {dimension_numbers = #tpu.dot_dimension_numbers<[2], [2], [1], [1], [0, 0, 0, 1, 1, 1], [0], [0]>} : vector<2x8x8xf32>, vector<2x8x8xf32>, vector<2x8x8xf32> -> vector<2x8x8xf32>
    "tpu.trace_stop"() : () -> ()
    %cst_27 = arith.constant 0.353553385 : f32
    %70 = vector.broadcast %cst_27 : f32 to vector<2x8x8xf32>
    %71 = arith.mulf %69, %70 : vector<2x8x8xf32>
    %cst_28 = arith.constant dense<0xFF800000> : vector<2x8xf32>
    %72 = vector.multi_reduction <maximumf>, %71, %cst_28 [2] : vector<2x8x8xf32> to vector<2x8xf32>
    %73 = vector.shape_cast %72 : vector<2x8xf32> to vector<2x8x1xf32>
    %74 = vector.broadcast %73 : vector<2x8x1xf32> to vector<2x8x8xf32>
    %75 = arith.subf %71, %74 : vector<2x8x8xf32>
    %76 = math.exp %75 : vector<2x8x8xf32>
    %cst_29 = arith.constant dense<0.000000e+00> : vector<2x8xf32>
    %77 = vector.multi_reduction <add>, %76, %cst_29 [2] : vector<2x8x8xf32> to vector<2x8xf32>
    %78 = vector.shape_cast %77 : vector<2x8xf32> to vector<2x8x1xf32>
    %79 = tpu.reciprocal %78 {approx = true} : vector<2x8x1xf32> -> vector<2x8x1xf32>
    %80 = vector.broadcast %79 : vector<2x8x1xf32> to vector<2x8x8xf32>
    %81 = arith.mulf %76, %80 : vector<2x8x8xf32>
    "tpu.trace_start"() <{level = 10 : i32, message = "bqk,bkd->bqd"}> : () -> ()
    %cst_30 = arith.constant dense<0.000000e+00> : vector<2x8x8xf32>
    %82 = tpu.matmul %81, %68, %cst_30 {dimension_numbers = #tpu.dot_dimension_numbers<[2], [1], [1], [2], [0, 0, 0, 1, 1, 2], [0], [0]>} : vector<2x8x8xf32>, vector<2x8x8xf32>, vector<2x8x8xf32> -> vector<2x8x8xf32>
    "tpu.trace_stop"() : () -> ()
    %83 = vector.shape_cast %82 : vector<2x8x8xf32> to vector<16x8xf32>
    %84 = vector.extract_strided_slice %38 {offsets = [8, 0], sizes = [8, 32], strides = [1, 1]} : vector<32x32xf32> to vector<8x32xf32>
    %cst_31 = arith.constant dense<0.000000e+00> : vector<16x32xf32>
    %85 = tpu.matmul %83, %84, %cst_31 {dimension_numbers = #tpu.dot_dimension_numbers<[1], [0], [0], [1], [0, 0, 1, 1], [], []>} : vector<16x8xf32>, vector<8x32xf32>, vector<16x32xf32> -> vector<16x32xf32>
    %86 = arith.addf %62, %85 : vector<16x32xf32>
    %87 = vector.extract_strided_slice %35 {offsets = [0, 16], sizes = [16, 8], strides = [1, 1]} : vector<16x32xf32> to vector<16x8xf32>
    %88 = vector.shape_cast %87 : vector<16x8xf32> to vector<2x8x8xf32>
    %89 = vector.extract_strided_slice %36 {offsets = [0, 16], sizes = [16, 8], strides = [1, 1]} : vector<16x32xf32> to vector<16x8xf32>
    %90 = vector.shape_cast %89 : vector<16x8xf32> to vector<2x8x8xf32>
    %91 = vector.extract_strided_slice %37 {offsets = [0, 16], sizes = [16, 8], strides = [1, 1]} : vector<16x32xf32> to vector<16x8xf32>
    %92 = vector.shape_cast %91 : vector<16x8xf32> to vector<2x8x8xf32>
    "tpu.trace_start"() <{level = 10 : i32, message = "bqd,bkd->bqk"}> : () -> ()
    %cst_32 = arith.constant dense<0.000000e+00> : vector<2x8x8xf32>
    %93 = tpu.matmul %88, %90, %cst_32 {dimension_numbers = #tpu.dot_dimension_numbers<[2], [2], [1], [1], [0, 0, 0, 1, 1, 1], [0], [0]>} : vector<2x8x8xf32>, vector<2x8x8xf32>, vector<2x8x8xf32> -> vector<2x8x8xf32>
    "tpu.trace_stop"() : () -> ()
    %cst_33 = arith.constant 0.353553385 : f32
    %94 = vector.broadcast %cst_33 : f32 to vector<2x8x8xf32>
    %95 = arith.mulf %93, %94 : vector<2x8x8xf32>
    %cst_34 = arith.constant dense<0xFF800000> : vector<2x8xf32>
    %96 = vector.multi_reduction <maximumf>, %95, %cst_34 [2] : vector<2x8x8xf32> to vector<2x8xf32>
    %97 = vector.shape_cast %96 : vector<2x8xf32> to vector<2x8x1xf32>
    %98 = vector.broadcast %97 : vector<2x8x1xf32> to vector<2x8x8xf32>
    %99 = arith.subf %95, %98 : vector<2x8x8xf32>
    %100 = math.exp %99 : vector<2x8x8xf32>
    %cst_35 = arith.constant dense<0.000000e+00> : vector<2x8xf32>
    %101 = vector.multi_reduction <add>, %100, %cst_35 [2] : vector<2x8x8xf32> to vector<2x8xf32>
    %102 = vector.shape_cast %101 : vector<2x8xf32> to vector<2x8x1xf32>
    %103 = tpu.reciprocal %102 {approx = true} : vector<2x8x1xf32> -> vector<2x8x1xf32>
    %104 = vector.broadcast %103 : vector<2x8x1xf32> to vector<2x8x8xf32>
    %105 = arith.mulf %100, %104 : vector<2x8x8xf32>
    "tpu.trace_start"() <{level = 10 : i32, message = "bqk,bkd->bqd"}> : () -> ()
    %cst_36 = arith.constant dense<0.000000e+00> : vector<2x8x8xf32>
    %106 = tpu.matmul %105, %92, %cst_36 {dimension_numbers = #tpu.dot_dimension_numbers<[2], [1], [1], [2], [0, 0, 0, 1, 1, 2], [0], [0]>} : vector<2x8x8xf32>, vector<2x8x8xf32>, vector<2x8x8xf32> -> vector<2x8x8xf32>
    "tpu.trace_stop"() : () -> ()
    %107 = vector.shape_cast %106 : vector<2x8x8xf32> to vector<16x8xf32>
    %108 = vector.extract_strided_slice %38 {offsets = [16, 0], sizes = [8, 32], strides = [1, 1]} : vector<32x32xf32> to vector<8x32xf32>
    %cst_37 = arith.constant dense<0.000000e+00> : vector<16x32xf32>
    %109 = tpu.matmul %107, %108, %cst_37 {dimension_numbers = #tpu.dot_dimension_numbers<[1], [0], [0], [1], [0, 0, 1, 1], [], []>} : vector<16x8xf32>, vector<8x32xf32>, vector<16x32xf32> -> vector<16x32xf32>
    %110 = arith.addf %86, %109 : vector<16x32xf32>
    %111 = vector.extract_strided_slice %35 {offsets = [0, 24], sizes = [16, 8], strides = [1, 1]} : vector<16x32xf32> to vector<16x8xf32>
    %112 = vector.shape_cast %111 : vector<16x8xf32> to vector<2x8x8xf32>
    %113 = vector.extract_strided_slice %36 {offsets = [0, 24], sizes = [16, 8], strides = [1, 1]} : vector<16x32xf32> to vector<16x8xf32>
    %114 = vector.shape_cast %113 : vector<16x8xf32> to vector<2x8x8xf32>
    %115 = vector.extract_strided_slice %37 {offsets = [0, 24], sizes = [16, 8], strides = [1, 1]} : vector<16x32xf32> to vector<16x8xf32>
    %116 = vector.shape_cast %115 : vector<16x8xf32> to vector<2x8x8xf32>
    "tpu.trace_start"() <{level = 10 : i32, message = "bqd,bkd->bqk"}> : () -> ()
    %cst_38 = arith.constant dense<0.000000e+00> : vector<2x8x8xf32>
    %117 = tpu.matmul %112, %114, %cst_38 {dimension_numbers = #tpu.dot_dimension_numbers<[2], [2], [1], [1], [0, 0, 0, 1, 1, 1], [0], [0]>} : vector<2x8x8xf32>, vector<2x8x8xf32>, vector<2x8x8xf32> -> vector<2x8x8xf32>
    "tpu.trace_stop"() : () -> ()
    %cst_39 = arith.constant 0.353553385 : f32
    %118 = vector.broadcast %cst_39 : f32 to vector<2x8x8xf32>
    %119 = arith.mulf %117, %118 : vector<2x8x8xf32>
    %cst_40 = arith.constant dense<0xFF800000> : vector<2x8xf32>
    %120 = vector.multi_reduction <maximumf>, %119, %cst_40 [2] : vector<2x8x8xf32> to vector<2x8xf32>
    %121 = vector.shape_cast %120 : vector<2x8xf32> to vector<2x8x1xf32>
    %122 = vector.broadcast %121 : vector<2x8x1xf32> to vector<2x8x8xf32>
    %123 = arith.subf %119, %122 : vector<2x8x8xf32>
    %124 = math.exp %123 : vector<2x8x8xf32>
    %cst_41 = arith.constant dense<0.000000e+00> : vector<2x8xf32>
    %125 = vector.multi_reduction <add>, %124, %cst_41 [2] : vector<2x8x8xf32> to vector<2x8xf32>
    %126 = vector.shape_cast %125 : vector<2x8xf32> to vector<2x8x1xf32>
    %127 = tpu.reciprocal %126 {approx = true} : vector<2x8x1xf32> -> vector<2x8x1xf32>
    %128 = vector.broadcast %127 : vector<2x8x1xf32> to vector<2x8x8xf32>
    %129 = arith.mulf %124, %128 : vector<2x8x8xf32>
    "tpu.trace_start"() <{level = 10 : i32, message = "bqk,bkd->bqd"}> : () -> ()
    %cst_42 = arith.constant dense<0.000000e+00> : vector<2x8x8xf32>
    %130 = tpu.matmul %129, %116, %cst_42 {dimension_numbers = #tpu.dot_dimension_numbers<[2], [1], [1], [2], [0, 0, 0, 1, 1, 2], [0], [0]>} : vector<2x8x8xf32>, vector<2x8x8xf32>, vector<2x8x8xf32> -> vector<2x8x8xf32>
    "tpu.trace_stop"() : () -> ()
    %131 = vector.shape_cast %130 : vector<2x8x8xf32> to vector<16x8xf32>
    %132 = vector.extract_strided_slice %38 {offsets = [24, 0], sizes = [8, 32], strides = [1, 1]} : vector<32x32xf32> to vector<8x32xf32>
    %cst_43 = arith.constant dense<0.000000e+00> : vector<16x32xf32>
    %133 = tpu.matmul %131, %132, %cst_43 {dimension_numbers = #tpu.dot_dimension_numbers<[1], [0], [0], [1], [0, 0, 1, 1], [], []>} : vector<16x8xf32>, vector<8x32xf32>, vector<16x32xf32> -> vector<16x32xf32>
    %134 = arith.addf %110, %133 : vector<16x32xf32>
    %135 = vector.broadcast %39 : vector<1x32xf32> to vector<16x32xf32>
    %136 = arith.addf %134, %135 : vector<16x32xf32>
    %137 = arith.addf %7, %136 : vector<16x32xf32>
    %cst_44 = arith.constant dense<0.000000e+00> : vector<16xf32>
    %138 = vector.multi_reduction <add>, %5, %cst_44 [1] : vector<16x32xf32> to vector<16xf32>
    %139 = vector.shape_cast %138 : vector<16xf32> to vector<16x1xf32>
    %cst_45 = arith.constant 3.200000e+01 : f32
    %140 = vector.broadcast %cst_45 : f32 to vector<16x1xf32>
    %141 = arith.divf %139, %140 : vector<16x1xf32>
    %142 = vector.broadcast %141 : vector<16x1xf32> to vector<16x32xf32>
    %143 = arith.subf %5, %142 : vector<16x32xf32>
    %144 = arith.mulf %143, %143 : vector<16x32xf32>
    %cst_46 = arith.constant dense<0.000000e+00> : vector<16xf32>
    %145 = vector.multi_reduction <add>, %144, %cst_46 [1] : vector<16x32xf32> to vector<16xf32>
    %146 = vector.shape_cast %145 : vector<16xf32> to vector<16x1xf32>
    %cst_47 = arith.constant 3.200000e+01 : f32
    %147 = vector.broadcast %cst_47 : f32 to vector<16x1xf32>
    %148 = arith.divf %146, %147 : vector<16x1xf32>
    %149 = vector.broadcast %141 : vector<16x1xf32> to vector<16x32xf32>
    %150 = arith.subf %5, %149 : vector<16x32xf32>
    %cst_48 = arith.constant 9.99999974E-6 : f32
    %151 = vector.broadcast %cst_48 : f32 to vector<16x1xf32>
    %152 = arith.addf %148, %151 : vector<16x1xf32>
    %153 = math.rsqrt %152 : vector<16x1xf32>
    %154 = vector.broadcast %153 : vector<16x1xf32> to vector<16x32xf32>
    %155 = arith.mulf %150, %154 : vector<16x32xf32>
    %156 = vector.broadcast %0 : vector<1x32xf32> to vector<16x32xf32>
    %157 = arith.mulf %155, %156 : vector<16x32xf32>
    %158 = vector.broadcast %1 : vector<1x32xf32> to vector<16x32xf32>
    %159 = arith.addf %157, %158 : vector<16x32xf32>
    %c0_49 = arith.constant 0 : index
    %c128 = arith.constant 128 : index
    %160 = vector.load %arg3[%c0_49, %c128] : memref<32x320xf32, #tpu.memory_space<vmem>>, vector<32x64xf32>
    %cst_50 = arith.constant dense<0.000000e+00> : vector<16x64xf32>
    %161 = tpu.matmul %159, %160, %cst_50 {dimension_numbers = #tpu.dot_dimension_numbers<[1], [0], [0], [1], [0, 0, 1, 1], [], []>} : vector<16x32xf32>, vector<32x64xf32>, vector<16x64xf32> -> vector<16x64xf32>
    %c6 = arith.constant 6 : index
    %c0_51 = arith.constant 0 : index
    %162 = vector.load %arg5[%c6, %c0_51] : memref<16x128xf32, #tpu.memory_space<vmem>>, vector<1x64xf32>
    %163 = vector.broadcast %162 : vector<1x64xf32> to vector<16x64xf32>
    %164 = arith.addf %161, %163 : vector<16x64xf32>
    %c0_52 = arith.constant 0 : index
    %c192 = arith.constant 192 : index
    %165 = vector.load %arg3[%c0_52, %c192] : memref<32x320xf32, #tpu.memory_space<vmem>>, vector<32x32xf32>
    %cst_53 = arith.constant dense<0.000000e+00> : vector<16x32xf32>
    %166 = tpu.matmul %137, %165, %cst_53 {dimension_numbers = #tpu.dot_dimension_numbers<[1], [0], [0], [1], [0, 0, 1, 1], [], []>} : vector<16x32xf32>, vector<32x32xf32>, vector<16x32xf32> -> vector<16x32xf32>
    %c7 = arith.constant 7 : index
    %c0_54 = arith.constant 0 : index
    %167 = vector.load %arg5[%c7, %c0_54] : memref<16x128xf32, #tpu.memory_space<vmem>>, vector<1x32xf32>
    %168 = vector.broadcast %167 : vector<1x32xf32> to vector<16x32xf32>
    %169 = arith.addf %166, %168 : vector<16x32xf32>
    %170 = vector.extract_strided_slice %164 {offsets = [0, 0], sizes = [16, 32], strides = [1, 1]} : vector<16x64xf32> to vector<16x32xf32>
    %171 = vector.extract_strided_slice %164 {offsets = [0, 32], sizes = [16, 32], strides = [1, 1]} : vector<16x64xf32> to vector<16x32xf32>
    %c0_55 = arith.constant 0 : index
    %c224 = arith.constant 224 : index
    %172 = vector.load %arg3[%c0_55, %c224] : memref<32x320xf32, #tpu.memory_space<vmem>>, vector<32x32xf32>
    %c8 = arith.constant 8 : index
    %c0_56 = arith.constant 0 : index
    %173 = vector.load %arg5[%c8, %c0_56] : memref<16x128xf32, #tpu.memory_space<vmem>>, vector<1x32xf32>
    %174 = vector.extract_strided_slice %170 {offsets = [0, 0], sizes = [16, 8], strides = [1, 1]} : vector<16x32xf32> to vector<16x8xf32>
    %175 = vector.shape_cast %174 : vector<16x8xf32> to vector<2x8x8xf32>
    %176 = vector.extract_strided_slice %171 {offsets = [0, 0], sizes = [16, 8], strides = [1, 1]} : vector<16x32xf32> to vector<16x8xf32>
    %177 = vector.shape_cast %176 : vector<16x8xf32> to vector<2x8x8xf32>
    %178 = vector.extract_strided_slice %169 {offsets = [0, 0], sizes = [16, 8], strides = [1, 1]} : vector<16x32xf32> to vector<16x8xf32>
    %179 = vector.shape_cast %178 : vector<16x8xf32> to vector<2x8x8xf32>
    "tpu.trace_start"() <{level = 10 : i32, message = "bqd,bkd->bqk"}> : () -> ()
    %cst_57 = arith.constant dense<0.000000e+00> : vector<2x8x8xf32>
    %180 = tpu.matmul %175, %177, %cst_57 {dimension_numbers = #tpu.dot_dimension_numbers<[2], [2], [1], [1], [0, 0, 0, 1, 1, 1], [0], [0]>} : vector<2x8x8xf32>, vector<2x8x8xf32>, vector<2x8x8xf32> -> vector<2x8x8xf32>
    "tpu.trace_stop"() : () -> ()
    %cst_58 = arith.constant 0.353553385 : f32
    %181 = vector.broadcast %cst_58 : f32 to vector<2x8x8xf32>
    %182 = arith.mulf %180, %181 : vector<2x8x8xf32>
    %cst_59 = arith.constant dense<0xFF800000> : vector<2x8xf32>
    %183 = vector.multi_reduction <maximumf>, %182, %cst_59 [2] : vector<2x8x8xf32> to vector<2x8xf32>
    %184 = vector.shape_cast %183 : vector<2x8xf32> to vector<2x8x1xf32>
    %185 = vector.broadcast %184 : vector<2x8x1xf32> to vector<2x8x8xf32>
    %186 = arith.subf %182, %185 : vector<2x8x8xf32>
    %187 = math.exp %186 : vector<2x8x8xf32>
    %cst_60 = arith.constant dense<0.000000e+00> : vector<2x8xf32>
    %188 = vector.multi_reduction <add>, %187, %cst_60 [2] : vector<2x8x8xf32> to vector<2x8xf32>
    %189 = vector.shape_cast %188 : vector<2x8xf32> to vector<2x8x1xf32>
    %190 = tpu.reciprocal %189 {approx = true} : vector<2x8x1xf32> -> vector<2x8x1xf32>
    %191 = vector.broadcast %190 : vector<2x8x1xf32> to vector<2x8x8xf32>
    %192 = arith.mulf %187, %191 : vector<2x8x8xf32>
    "tpu.trace_start"() <{level = 10 : i32, message = "bqk,bkd->bqd"}> : () -> ()
    %cst_61 = arith.constant dense<0.000000e+00> : vector<2x8x8xf32>
    %193 = tpu.matmul %192, %179, %cst_61 {dimension_numbers = #tpu.dot_dimension_numbers<[2], [1], [1], [2], [0, 0, 0, 1, 1, 2], [0], [0]>} : vector<2x8x8xf32>, vector<2x8x8xf32>, vector<2x8x8xf32> -> vector<2x8x8xf32>
    "tpu.trace_stop"() : () -> ()
    %194 = vector.shape_cast %193 : vector<2x8x8xf32> to vector<16x8xf32>
    %195 = vector.extract_strided_slice %172 {offsets = [0, 0], sizes = [8, 32], strides = [1, 1]} : vector<32x32xf32> to vector<8x32xf32>
    %cst_62 = arith.constant dense<0.000000e+00> : vector<16x32xf32>
    %196 = tpu.matmul %194, %195, %cst_62 {dimension_numbers = #tpu.dot_dimension_numbers<[1], [0], [0], [1], [0, 0, 1, 1], [], []>} : vector<16x8xf32>, vector<8x32xf32>, vector<16x32xf32> -> vector<16x32xf32>
    %197 = vector.extract_strided_slice %170 {offsets = [0, 8], sizes = [16, 8], strides = [1, 1]} : vector<16x32xf32> to vector<16x8xf32>
    %198 = vector.shape_cast %197 : vector<16x8xf32> to vector<2x8x8xf32>
    %199 = vector.extract_strided_slice %171 {offsets = [0, 8], sizes = [16, 8], strides = [1, 1]} : vector<16x32xf32> to vector<16x8xf32>
    %200 = vector.shape_cast %199 : vector<16x8xf32> to vector<2x8x8xf32>
    %201 = vector.extract_strided_slice %169 {offsets = [0, 8], sizes = [16, 8], strides = [1, 1]} : vector<16x32xf32> to vector<16x8xf32>
    %202 = vector.shape_cast %201 : vector<16x8xf32> to vector<2x8x8xf32>
    "tpu.trace_start"() <{level = 10 : i32, message = "bqd,bkd->bqk"}> : () -> ()
    %cst_63 = arith.constant dense<0.000000e+00> : vector<2x8x8xf32>
    %203 = tpu.matmul %198, %200, %cst_63 {dimension_numbers = #tpu.dot_dimension_numbers<[2], [2], [1], [1], [0, 0, 0, 1, 1, 1], [0], [0]>} : vector<2x8x8xf32>, vector<2x8x8xf32>, vector<2x8x8xf32> -> vector<2x8x8xf32>
    "tpu.trace_stop"() : () -> ()
    %cst_64 = arith.constant 0.353553385 : f32
    %204 = vector.broadcast %cst_64 : f32 to vector<2x8x8xf32>
    %205 = arith.mulf %203, %204 : vector<2x8x8xf32>
    %cst_65 = arith.constant dense<0xFF800000> : vector<2x8xf32>
    %206 = vector.multi_reduction <maximumf>, %205, %cst_65 [2] : vector<2x8x8xf32> to vector<2x8xf32>
    %207 = vector.shape_cast %206 : vector<2x8xf32> to vector<2x8x1xf32>
    %208 = vector.broadcast %207 : vector<2x8x1xf32> to vector<2x8x8xf32>
    %209 = arith.subf %205, %208 : vector<2x8x8xf32>
    %210 = math.exp %209 : vector<2x8x8xf32>
    %cst_66 = arith.constant dense<0.000000e+00> : vector<2x8xf32>
    %211 = vector.multi_reduction <add>, %210, %cst_66 [2] : vector<2x8x8xf32> to vector<2x8xf32>
    %212 = vector.shape_cast %211 : vector<2x8xf32> to vector<2x8x1xf32>
    %213 = tpu.reciprocal %212 {approx = true} : vector<2x8x1xf32> -> vector<2x8x1xf32>
    %214 = vector.broadcast %213 : vector<2x8x1xf32> to vector<2x8x8xf32>
    %215 = arith.mulf %210, %214 : vector<2x8x8xf32>
    "tpu.trace_start"() <{level = 10 : i32, message = "bqk,bkd->bqd"}> : () -> ()
    %cst_67 = arith.constant dense<0.000000e+00> : vector<2x8x8xf32>
    %216 = tpu.matmul %215, %202, %cst_67 {dimension_numbers = #tpu.dot_dimension_numbers<[2], [1], [1], [2], [0, 0, 0, 1, 1, 2], [0], [0]>} : vector<2x8x8xf32>, vector<2x8x8xf32>, vector<2x8x8xf32> -> vector<2x8x8xf32>
    "tpu.trace_stop"() : () -> ()
    %217 = vector.shape_cast %216 : vector<2x8x8xf32> to vector<16x8xf32>
    %218 = vector.extract_strided_slice %172 {offsets = [8, 0], sizes = [8, 32], strides = [1, 1]} : vector<32x32xf32> to vector<8x32xf32>
    %cst_68 = arith.constant dense<0.000000e+00> : vector<16x32xf32>
    %219 = tpu.matmul %217, %218, %cst_68 {dimension_numbers = #tpu.dot_dimension_numbers<[1], [0], [0], [1], [0, 0, 1, 1], [], []>} : vector<16x8xf32>, vector<8x32xf32>, vector<16x32xf32> -> vector<16x32xf32>
    %220 = arith.addf %196, %219 : vector<16x32xf32>
    %221 = vector.extract_strided_slice %170 {offsets = [0, 16], sizes = [16, 8], strides = [1, 1]} : vector<16x32xf32> to vector<16x8xf32>
    %222 = vector.shape_cast %221 : vector<16x8xf32> to vector<2x8x8xf32>
    %223 = vector.extract_strided_slice %171 {offsets = [0, 16], sizes = [16, 8], strides = [1, 1]} : vector<16x32xf32> to vector<16x8xf32>
    %224 = vector.shape_cast %223 : vector<16x8xf32> to vector<2x8x8xf32>
    %225 = vector.extract_strided_slice %169 {offsets = [0, 16], sizes = [16, 8], strides = [1, 1]} : vector<16x32xf32> to vector<16x8xf32>
    %226 = vector.shape_cast %225 : vector<16x8xf32> to vector<2x8x8xf32>
    "tpu.trace_start"() <{level = 10 : i32, message = "bqd,bkd->bqk"}> : () -> ()
    %cst_69 = arith.constant dense<0.000000e+00> : vector<2x8x8xf32>
    %227 = tpu.matmul %222, %224, %cst_69 {dimension_numbers = #tpu.dot_dimension_numbers<[2], [2], [1], [1], [0, 0, 0, 1, 1, 1], [0], [0]>} : vector<2x8x8xf32>, vector<2x8x8xf32>, vector<2x8x8xf32> -> vector<2x8x8xf32>
    "tpu.trace_stop"() : () -> ()
    %cst_70 = arith.constant 0.353553385 : f32
    %228 = vector.broadcast %cst_70 : f32 to vector<2x8x8xf32>
    %229 = arith.mulf %227, %228 : vector<2x8x8xf32>
    %cst_71 = arith.constant dense<0xFF800000> : vector<2x8xf32>
    %230 = vector.multi_reduction <maximumf>, %229, %cst_71 [2] : vector<2x8x8xf32> to vector<2x8xf32>
    %231 = vector.shape_cast %230 : vector<2x8xf32> to vector<2x8x1xf32>
    %232 = vector.broadcast %231 : vector<2x8x1xf32> to vector<2x8x8xf32>
    %233 = arith.subf %229, %232 : vector<2x8x8xf32>
    %234 = math.exp %233 : vector<2x8x8xf32>
    %cst_72 = arith.constant dense<0.000000e+00> : vector<2x8xf32>
    %235 = vector.multi_reduction <add>, %234, %cst_72 [2] : vector<2x8x8xf32> to vector<2x8xf32>
    %236 = vector.shape_cast %235 : vector<2x8xf32> to vector<2x8x1xf32>
    %237 = tpu.reciprocal %236 {approx = true} : vector<2x8x1xf32> -> vector<2x8x1xf32>
    %238 = vector.broadcast %237 : vector<2x8x1xf32> to vector<2x8x8xf32>
    %239 = arith.mulf %234, %238 : vector<2x8x8xf32>
    "tpu.trace_start"() <{level = 10 : i32, message = "bqk,bkd->bqd"}> : () -> ()
    %cst_73 = arith.constant dense<0.000000e+00> : vector<2x8x8xf32>
    %240 = tpu.matmul %239, %226, %cst_73 {dimension_numbers = #tpu.dot_dimension_numbers<[2], [1], [1], [2], [0, 0, 0, 1, 1, 2], [0], [0]>} : vector<2x8x8xf32>, vector<2x8x8xf32>, vector<2x8x8xf32> -> vector<2x8x8xf32>
    "tpu.trace_stop"() : () -> ()
    %241 = vector.shape_cast %240 : vector<2x8x8xf32> to vector<16x8xf32>
    %242 = vector.extract_strided_slice %172 {offsets = [16, 0], sizes = [8, 32], strides = [1, 1]} : vector<32x32xf32> to vector<8x32xf32>
    %cst_74 = arith.constant dense<0.000000e+00> : vector<16x32xf32>
    %243 = tpu.matmul %241, %242, %cst_74 {dimension_numbers = #tpu.dot_dimension_numbers<[1], [0], [0], [1], [0, 0, 1, 1], [], []>} : vector<16x8xf32>, vector<8x32xf32>, vector<16x32xf32> -> vector<16x32xf32>
    %244 = arith.addf %220, %243 : vector<16x32xf32>
    %245 = vector.extract_strided_slice %170 {offsets = [0, 24], sizes = [16, 8], strides = [1, 1]} : vector<16x32xf32> to vector<16x8xf32>
    %246 = vector.shape_cast %245 : vector<16x8xf32> to vector<2x8x8xf32>
    %247 = vector.extract_strided_slice %171 {offsets = [0, 24], sizes = [16, 8], strides = [1, 1]} : vector<16x32xf32> to vector<16x8xf32>
    %248 = vector.shape_cast %247 : vector<16x8xf32> to vector<2x8x8xf32>
    %249 = vector.extract_strided_slice %169 {offsets = [0, 24], sizes = [16, 8], strides = [1, 1]} : vector<16x32xf32> to vector<16x8xf32>
    %250 = vector.shape_cast %249 : vector<16x8xf32> to vector<2x8x8xf32>
    "tpu.trace_start"() <{level = 10 : i32, message = "bqd,bkd->bqk"}> : () -> ()
    %cst_75 = arith.constant dense<0.000000e+00> : vector<2x8x8xf32>
    %251 = tpu.matmul %246, %248, %cst_75 {dimension_numbers = #tpu.dot_dimension_numbers<[2], [2], [1], [1], [0, 0, 0, 1, 1, 1], [0], [0]>} : vector<2x8x8xf32>, vector<2x8x8xf32>, vector<2x8x8xf32> -> vector<2x8x8xf32>
    "tpu.trace_stop"() : () -> ()
    %cst_76 = arith.constant 0.353553385 : f32
    %252 = vector.broadcast %cst_76 : f32 to vector<2x8x8xf32>
    %253 = arith.mulf %251, %252 : vector<2x8x8xf32>
    %cst_77 = arith.constant dense<0xFF800000> : vector<2x8xf32>
    %254 = vector.multi_reduction <maximumf>, %253, %cst_77 [2] : vector<2x8x8xf32> to vector<2x8xf32>
    %255 = vector.shape_cast %254 : vector<2x8xf32> to vector<2x8x1xf32>
    %256 = vector.broadcast %255 : vector<2x8x1xf32> to vector<2x8x8xf32>
    %257 = arith.subf %253, %256 : vector<2x8x8xf32>
    %258 = math.exp %257 : vector<2x8x8xf32>
    %cst_78 = arith.constant dense<0.000000e+00> : vector<2x8xf32>
    %259 = vector.multi_reduction <add>, %258, %cst_78 [2] : vector<2x8x8xf32> to vector<2x8xf32>
    %260 = vector.shape_cast %259 : vector<2x8xf32> to vector<2x8x1xf32>
    %261 = tpu.reciprocal %260 {approx = true} : vector<2x8x1xf32> -> vector<2x8x1xf32>
    %262 = vector.broadcast %261 : vector<2x8x1xf32> to vector<2x8x8xf32>
    %263 = arith.mulf %258, %262 : vector<2x8x8xf32>
    "tpu.trace_start"() <{level = 10 : i32, message = "bqk,bkd->bqd"}> : () -> ()
    %cst_79 = arith.constant dense<0.000000e+00> : vector<2x8x8xf32>
    %264 = tpu.matmul %263, %250, %cst_79 {dimension_numbers = #tpu.dot_dimension_numbers<[2], [1], [1], [2], [0, 0, 0, 1, 1, 2], [0], [0]>} : vector<2x8x8xf32>, vector<2x8x8xf32>, vector<2x8x8xf32> -> vector<2x8x8xf32>
    "tpu.trace_stop"() : () -> ()
    %265 = vector.shape_cast %264 : vector<2x8x8xf32> to vector<16x8xf32>
    %266 = vector.extract_strided_slice %172 {offsets = [24, 0], sizes = [8, 32], strides = [1, 1]} : vector<32x32xf32> to vector<8x32xf32>
    %cst_80 = arith.constant dense<0.000000e+00> : vector<16x32xf32>
    %267 = tpu.matmul %265, %266, %cst_80 {dimension_numbers = #tpu.dot_dimension_numbers<[1], [0], [0], [1], [0, 0, 1, 1], [], []>} : vector<16x8xf32>, vector<8x32xf32>, vector<16x32xf32> -> vector<16x32xf32>
    %268 = arith.addf %244, %267 : vector<16x32xf32>
    %269 = vector.broadcast %173 : vector<1x32xf32> to vector<16x32xf32>
    %270 = arith.addf %268, %269 : vector<16x32xf32>
    %271 = arith.addf %5, %270 : vector<16x32xf32>
    %cst_81 = arith.constant dense<0.000000e+00> : vector<16xf32>
    %272 = vector.multi_reduction <add>, %271, %cst_81 [1] : vector<16x32xf32> to vector<16xf32>
    %273 = vector.shape_cast %272 : vector<16xf32> to vector<16x1xf32>
    %cst_82 = arith.constant 3.200000e+01 : f32
    %274 = vector.broadcast %cst_82 : f32 to vector<16x1xf32>
    %275 = arith.divf %273, %274 : vector<16x1xf32>
    %276 = vector.broadcast %275 : vector<16x1xf32> to vector<16x32xf32>
    %277 = arith.subf %271, %276 : vector<16x32xf32>
    %278 = arith.mulf %277, %277 : vector<16x32xf32>
    %cst_83 = arith.constant dense<0.000000e+00> : vector<16xf32>
    %279 = vector.multi_reduction <add>, %278, %cst_83 [1] : vector<16x32xf32> to vector<16xf32>
    %280 = vector.shape_cast %279 : vector<16xf32> to vector<16x1xf32>
    %cst_84 = arith.constant 3.200000e+01 : f32
    %281 = vector.broadcast %cst_84 : f32 to vector<16x1xf32>
    %282 = arith.divf %280, %281 : vector<16x1xf32>
    %283 = vector.broadcast %275 : vector<16x1xf32> to vector<16x32xf32>
    %284 = arith.subf %271, %283 : vector<16x32xf32>
    %cst_85 = arith.constant 9.99999974E-6 : f32
    %285 = vector.broadcast %cst_85 : f32 to vector<16x1xf32>
    %286 = arith.addf %282, %285 : vector<16x1xf32>
    %287 = math.rsqrt %286 : vector<16x1xf32>
    %288 = vector.broadcast %287 : vector<16x1xf32> to vector<16x32xf32>
    %289 = arith.mulf %284, %288 : vector<16x32xf32>
    %290 = vector.broadcast %2 : vector<1x32xf32> to vector<16x32xf32>
    %291 = arith.mulf %289, %290 : vector<16x32xf32>
    %292 = vector.broadcast %3 : vector<1x32xf32> to vector<16x32xf32>
    %293 = arith.addf %291, %292 : vector<16x32xf32>
    %c0_86 = arith.constant 0 : index
    %c256 = arith.constant 256 : index
    %294 = vector.load %arg3[%c0_86, %c256] : memref<32x320xf32, #tpu.memory_space<vmem>>, vector<32x64xf32>
    %cst_87 = arith.constant dense<0.000000e+00> : vector<16x64xf32>
    %295 = tpu.matmul %293, %294, %cst_87 {dimension_numbers = #tpu.dot_dimension_numbers<[1], [0], [0], [1], [0, 0, 1, 1], [], []>} : vector<16x32xf32>, vector<32x64xf32>, vector<16x64xf32> -> vector<16x64xf32>
    %c9 = arith.constant 9 : index
    %c0_88 = arith.constant 0 : index
    %296 = vector.load %arg5[%c9, %c0_88] : memref<16x128xf32, #tpu.memory_space<vmem>>, vector<1x64xf32>
    %297 = vector.broadcast %296 : vector<1x64xf32> to vector<16x64xf32>
    %298 = arith.addf %295, %297 : vector<16x64xf32>
    %cst_89 = arith.constant 0.000000e+00 : f32
    %299 = vector.broadcast %cst_89 : f32 to vector<16x64xf32>
    %300 = arith.maximumf %298, %299 : vector<16x64xf32>
    %c0_90 = arith.constant 0 : index
    %c0_91 = arith.constant 0 : index
    %301 = vector.load %arg4[%c0_90, %c0_91] : memref<64x32xf32, #tpu.memory_space<vmem>>, vector<64x32xf32>
    %cst_92 = arith.constant dense<0.000000e+00> : vector<16x32xf32>
    %302 = tpu.matmul %300, %301, %cst_92 {dimension_numbers = #tpu.dot_dimension_numbers<[1], [0], [0], [1], [0, 0, 1, 1], [], []>} : vector<16x64xf32>, vector<64x32xf32>, vector<16x32xf32> -> vector<16x32xf32>
    %c10 = arith.constant 10 : index
    %c0_93 = arith.constant 0 : index
    %303 = vector.load %arg5[%c10, %c0_93] : memref<16x128xf32, #tpu.memory_space<vmem>>, vector<1x32xf32>
    %304 = vector.broadcast %303 : vector<1x32xf32> to vector<16x32xf32>
    %305 = arith.addf %302, %304 : vector<16x32xf32>
    %306 = arith.addf %271, %305 : vector<16x32xf32>
    %307 = vector.shape_cast %306 : vector<16x32xf32> to vector<2x8x32xf32>
    %c0_94 = arith.constant 0 : index
    %c0_95 = arith.constant 0 : index
    %c0_96 = arith.constant 0 : index
    %308 = vector.load %arg6[%c0_94, %c0_95, %c0_96] : memref<2x8x32xf32, #tpu.memory_space<vmem>>, vector<2x8x32xf32>
    tpu.vector_store %arg6[%c0_94, %c0_95, %c0_96], %307 {strides = array<i32>} : memref<2x8x32xf32, #tpu.memory_space<vmem>>, vector<2x8x32xf32>,
    return
  }
  func.func @transform_0(%arg0: i32) -> (i32, i32, i32) {
    %c0_i32 = arith.constant 0 : i32
    %c0_i32_0 = arith.constant 0 : i32
    %c0_i32_1 = arith.constant 0 : i32
    return %arg0, %c0_i32, %c0_i32_0 : i32, i32, i32
  }
  func.func @transform_1(%arg0: i32) -> (i32, i32, i32) {
    %c0_i32 = arith.constant 0 : i32
    %c0_i32_0 = arith.constant 0 : i32
    %c0_i32_1 = arith.constant 0 : i32
    return %arg0, %c0_i32, %c0_i32_0 : i32, i32, i32
  }
  func.func @transform_2(%arg0: i32) -> (i32, i32) {
    %c0_i32 = arith.constant 0 : i32
    %c0_i32_0 = arith.constant 0 : i32
    %c0_i32_1 = arith.constant 0 : i32
    return %c0_i32, %c0_i32_0 : i32, i32
  }
  func.func @transform_3(%arg0: i32) -> (i32, i32) {
    %c0_i32 = arith.constant 0 : i32
    %c0_i32_0 = arith.constant 0 : i32
    %c0_i32_1 = arith.constant 0 : i32
    return %c0_i32, %c0_i32_0 : i32, i32
  }
  func.func @transform_4(%arg0: i32) -> (i32, i32) {
    %c0_i32 = arith.constant 0 : i32
    %c0_i32_0 = arith.constant 0 : i32
    %c0_i32_1 = arith.constant 0 : i32
    return %c0_i32, %c0_i32_0 : i32, i32
  }
  func.func @transform_5(%arg0: i32) -> (i32, i32, i32) {
    %c0_i32 = arith.constant 0 : i32
    %c0_i32_0 = arith.constant 0 : i32
    %c0_i32_1 = arith.constant 0 : i32
    return %arg0, %c0_i32, %c0_i32_0 : i32, i32, i32
  }
}

</mosaic_0001>

<bundles_post_ra>
// kernel: abstractor_module_layer.1
= control target key start
LH: loop header
LB: loop body
LE: loop exit
PB: predicated region body
PF: predicated region fallthrough
CT: control target
= control target key end

     0   :  { %vm29_vm0 = vcmask 261120   ;;  %s5212_s0 = inlined_call_operand.vmem [shape: f32[2,8,32], index: 0, kind: input, shape index: {}]   ;;  %s5213_s1 = inlined_call_operand.vmem [shape: f32[2,8,32], index: 1, kind: input, shape index: {}]   ;;  %s5214_s2 = inlined_call_operand.vmem [shape: f32[32,320], index: 2, kind: input, shape index: {}]   ;;  %s5215_s3 = inlined_call_operand.vmem [shape: f32[64,32], index: 3, kind: input, shape index: {}]   ;;  %s5216_s4 = inlined_call_operand.vmem [shape: f32[16,128], index: 4, kind: input, shape index: {}]   ;;  %s5217_s5 = inlined_call_operand.hbm [shape: f32[2,8,32], index: 5, kind: output, shape index: {}]  }
   0x1   :  { %v4684_v0 = vld [vmem:[%s5213_s1] sm:$0xff]  ;;  %v4689_v1 = vld [vmem:[%s5213_s1 + $0x8] sm:$0xff] }
   0x2   :  { %10 = vsyncpa [#allocation3], 0  ;;  %v30_v2 = vsel %vm29_vm0, %v4684_v0, 0.0  ;;  %v33_v3 = vsel %vm29_vm0, %v4689_v1, 0.0  ;;  %v4702_v14 = vld [vmem:[%s5214_s2] sm:$0xff]  ;;  %v4707_v15 = vld [vmem:[%s5214_s2 + $0x18] sm:$0xff] }
   0x3   :  { %31 = vadd.xlane.f32.xlu0 %v30_v2  ;;  %v4712_v16 = vld [vmem:[%s5214_s2 + $0x30] sm:$0xff]  ;;  %v4447_v17 = vpack.c.bf16 %v4707_v15, %v4702_v14  ;;  %v4719_v18 = vld [vmem:[%s5214_s2 + $0x48] sm:$0xff]  ;;  %v4726_v27 = vld [vmem:[%s5216_s4] ss:$0 sm:$0xff]  ;;  %v4634_v36 = vmov 0.0   ;;  %vm4635_vm1 = vmmov 0  }
   0x4   :  { %v4451_v19 = vpack.c.bf16 %v4719_v18, %v4712_v16  ;;  %v4731_v29 = vld [vmem:[%s5216_s4 + $0x1] ss:$0 sm:$0xff]  ;;  %4205 = vmatprep.subr.mxu0 %v4634_v36  ;;  %4207 = vmatprep.mubr.msk.f32.mxu0 %vm4635_vm1, %v4634_v36  ;;  %v3979_v37 = vld [vmem:[%s5216_s4 + $0x4] ss:$0 sm:$0xff]  ;;  %s4636_s10 = smov 96   ;;  %vm163_vm2 = vcmask 64512  }
   0x5   :  { %4448 = vmatprep.subr.bf16.mxu1 %v4447_v17  ;;  %s4637_s11 = smov 88   ;;  %s4638_s12 = smov 120   ;;  %vm3875_vm3 = vcmask 523264  }
   0x6   :  { %4450 = vmatpush3.bf16.msra.mxu1 %v4447_v17  ;;  %s4639_s13 = smov 80   ;;  %s4640_s14 = smov 64  }
   0x7   :  { %34 = vadd.xlane.f32.xlu0 %v33_v3  ;;  %4452 = vmatprep.subr.bf16.mxu1 %v4451_v19  ;;  %s4641_s15 = smov 56   ;;  %s4642_s16 = smov 112  }
   0x8   :  { %s4643_s17 = smov 32   ;;  %s4644_s18 = smov 48  }
   0x9   :  { %s4645_s19 = smov 72   ;;  %s4646_s20 = smov 104  }
   0xa   :  { %4454 = vmatpush3.bf16.msra.mxu1 %v4451_v19 }
   0xb   :  { %4195 = vmatprep.subr.mxu1 %v4634_v36 }
  0x90   :  { %v32_v4 = vpop.xlane.xlu0 %31 }
  0x91   :  { %v37_v5 = vmul.f32 0.03125, %v32_v4 }
  0x93   :  { %v39_v6 = vsub.f32 %v4684_v0, %v37_v5 }
  0x94   :  { %v35_v7 = vpop.xlane.xlu0 %34 }
  0x95   :  { %v38_v8 = vmul.f32 0.03125, %v35_v7  ;;  %v41_v9 = vmul.f32 %v39_v6, %v39_v6 }
  0x97   :  { %v40_v10 = vsub.f32 %v4689_v1, %v38_v8  ;;  %v43_v11 = vsel %vm29_vm0, %v41_v9, 0.0 }
  0x98   :  { %44 = vadd.xlane.f32.xlu1 %v43_v11 }
  0x99   :  { %v42_v12 = vmul.f32 %v40_v10, %v40_v10 }
  0x9b   :  { %v46_v13 = vsel %vm29_vm0, %v42_v12, 0.0 }
  0x9c   :  { %47 = vadd.xlane.f32.xlu1 %v46_v13 }
 0x125   :  { %v45_v20 = vpop.xlane.xlu1 %44 }
 0x126   :  { %v49_v21 = vmul.f32 0.03125, %v45_v20 }
 0x128   :  { %v51_v22 = vadd.f32 1e-05, %v49_v21 }
 0x129   :  { %v48_v23 = vpop.xlane.xlu1 %47 }
 0x12a   :  { %4534 = vrsqrt.f32 %v51_v22  ;;  %v50_v24 = vmul.f32 0.03125, %v48_v23 }
 0x12c   :  { %v52_v25 = vadd.f32 1e-05, %v50_v24 }
 0x12e   :  { %4536 = vrsqrt.f32 %v52_v25 }
 0x134   :  { %v4535_v26 = vpop.eup %4534 }
 0x135   :  { %v55_v28 = vmul.f32 %v4535_v26, %v39_v6 }
 0x137   :  { %v61_v30 = vmul.f32 %v4726_v27, %v55_v28 }
 0x138   :  { %v4537_v31 = vpop.eup %4536 }
 0x139   :  { %v67_v32 = vadd.f32 %v4731_v29, %v61_v30  ;;  %v56_v33 = vmul.f32 %v4537_v31, %v40_v10 }
 0x13b   :  { %4192 = vmatprep.mubr.msk.f32.mxu1 %vm29_vm0, %v67_v32  ;;  %v62_v34 = vmul.f32 %v4726_v27, %v56_v33 }
 0x13d   :  { %v68_v35 = vadd.f32 %v4731_v29, %v62_v34 }
 0x13f   :  { %4193 = vmatmul.mubr.msk.f32.vlgmr.msra.gmra.mrb[0].mxu1 %vm29_vm0, %v68_v35 }
 0x140   :  { %4197 = vmatprep.mubr.msk.f32.mxu1 %vm4635_vm1, %v4634_v36 }
 0x212   :  { %v4194_v38 = vpop.f32.mrb[0].mxu1 }
 0x213   :  { %v4748_v39 = vadd.f32 %v4194_v38, %v3979_v37  ;;  %v150_v40 = vpop.f32.mrb[1].mxu1 }
 0x214   :  { %v4750_v41 = vadd.f32 %v3979_v37, %v150_v40 }
 0x215   :  { %239 = vrot.lane.b32.xlu1 %v4748_v39, %s4636_s10 }
 0x216   :  { %161 = vrot.lane.b32.xlu0 %v4750_v41, %s4636_s10 }
 0x287   :  { %v240_v43 = vpop.permute.xlu1 %239 }
 0x288   :  { %v162_v42 = vpop.permute.xlu0 %161 }
 0x289   :  { %4196 = vmatpush3.xpose.msk.msra.mxu1 %vm163_vm2, %v162_v42 }
 0x28a   :  { %4200 = vmatprep.subr.mxu1 %v4634_v36 }
 0x28c   :  { %4198 = vmatmul.mubr.msk.f32.vlgmr.msra.gmra.mrb[2].mxu1 %vm163_vm2, %v4750_v41 }
 0x28d   :  { %4201 = vmatpush3.xpose.msk.msra.mxu1 %vm163_vm2, %v240_v43  ;;  %4202 = vmatprep.mubr.msk.f32.mxu1 %vm4635_vm1, %v4634_v36 }
 0x28e   :  { %4210 = vmatprep.subr.mxu1 %v4634_v36 }
 0x290   :  { %4203 = vmatmul.mubr.msk.f32.vlgmr.msra.gmra.mrb[4].mxu1 %vm163_vm2, %v4748_v39 }
 0x291   :  { %4212 = vmatprep.mubr.msk.f32.mxu1 %vm4635_vm1, %v4634_v36 }
 0x35f   :  { %v234_v44 = vpop.f32.mrb[2].mxu1 }
 0x360   :  { %v4199_v45 = vpop.f32.mrb[3].mxu1  ;;  %v315_v50 = vmul.f32 0.35355338, %v234_v44 }
 0x362   :  { %v317_v51 = vsel %vm163_vm2, %v315_v50, -inf }
 0x363   :  { %v311_v46 = vpop.f32.mrb[4].mxu1 }
 0x364   :  { %v316_v47 = vmul.f32 0.35355338, %v311_v46  ;;  %v4204_v48 = vpop.f32.mrb[5].mxu1 }
 0x366   :  { %v320_v49 = vsel %vm163_vm2, %v316_v47, -inf }
 0x367   :  { %321 = vmax.xlane.f32.xlu1 %v320_v49 }
 0x378   :  { %571 = vrot.lane.b32.xlu1 %v4748_v39, %s4637_s11 }
 0x37c   :  { %569 = vrot.lane.b32.xlu1 %v4748_v39, %s4638_s12 }
 0x3a0   :  { %318 = vmax.xlane.f32.xlu1 %v317_v51 }
 0x3b1   :  { %493 = vrot.lane.b32.xlu1 %v4750_v41, %s4637_s11 }
 0x3b5   :  { %491 = vrot.lane.b32.xlu1 %v4750_v41, %s4638_s12 }
 0x3b9   :  { %995 = vrot.lane.b32.xlu1 %v4750_v41, %s4639_s13 }
 0x3f4   :  { %v322_v52 = vpop.xlane.xlu1 %321 }
 0x3f5   :  { %v324_v53 = vsub.f32 %v316_v47, %v322_v52 }
 0x3f7   :  { %v327_v54 = vmul.f32 1.442695, %v324_v53 }
 0x3f8   :  { %v572_v57 = vpop.permute.xlu1 %571 }
 0x3f9   :  { %4538 = vpow2.f32 %v327_v54 }
 0x3fc   :  { %v570_v58 = vpop.permute.xlu1 %569 }
 0x403   :  { %v4539_v55 = vpop.eup %4538 }
 0x404   :  { %v332_v56 = vsel %vm163_vm2, %v4539_v55, 0.0 }
 0x405   :  { %333 = vadd.xlane.f32.xlu0 %v332_v56 }
 0x41b   :  { %415 = vrot.lane.b32.xlu0 %v4748_v39, %s4640_s14 }
 0x42d   :  { %v319_v59 = vpop.xlane.xlu1 %318 }
 0x42e   :  { %v323_v60 = vsub.f32 %v315_v50, %v319_v59 }
 0x430   :  { %v325_v61 = vmul.f32 1.442695, %v323_v60 }
 0x431   :  { %v494_v9 = vpop.permute.xlu1 %493 }
 0x432   :  { %4540 = vpow2.f32 %v325_v61 }
 0x435   :  { %v492_v11 = vpop.permute.xlu1 %491 }
 0x439   :  { %v996_v37 = vpop.permute.xlu1 %995 }
 0x43c   :  { %v4541_v62 = vpop.eup %4540 }
 0x43d   :  { %v329_v63 = vsel %vm163_vm2, %v4541_v62, 0.0 }
 0x43e   :  { %330 = vadd.xlane.f32.xlu0 %v329_v63 }
 0x454   :  { %339 = vrot.lane.b32.xlu0 %v4750_v41, %s4640_s14 }
 0x492   :  { %v334_v2 = vpop.xlane.xlu0 %333 }
 0x493   :  { %4542 = vrcp.f32 %v334_v2 }
 0x496   :  { %v416_v3 = vpop.permute.xlu0 %415 }
 0x497   :  { %4211 = vmatpush3.msra.mxu1 %v416_v3 }
 0x498   :  { %4220 = vmatprep.subr.mxu1 %v4634_v36 }
 0x49d   :  { %v4543_v4 = vpop.eup %4542 }
 0x49e   :  { %v338_v5 = vmul.f32 %v4543_v4, %v4539_v55 }
 0x4a0   :  { %4213 = vmatmul.mubr.msk.f32.vlgmr.msra.gmra.mrb[6].mxu1 %vm163_vm2, %v338_v5 }
 0x4a1   :  { %4221 = vmatpush3.xpose.msk.msra.mxu1 %vm163_vm2, %v572_v57  ;;  %4222 = vmatprep.mubr.msk.f32.mxu1 %vm4635_vm1, %v4634_v36 }
 0x4a2   :  { %4230 = vmatprep.subr.mxu1 %v4634_v36 }
 0x4a4   :  { %4223 = vmatmul.mubr.msk.f32.vlgmr.msra.gmra.mrb[8].mxu1 %vm163_vm2, %v570_v58 }
 0x4a5   :  { %4232 = vmatprep.mubr.msk.f32.mxu1 %vm4635_vm1, %v4634_v36 }
 0x4cb   :  { %v331_v6 = vpop.xlane.xlu0 %330 }
 0x4cc   :  { %4544 = vrcp.f32 %v331_v6 }
 0x4cf   :  { %v340_v7 = vpop.permute.xlu0 %339 }
 0x4d0   :  { %4206 = vmatpush3.msra.mxu0 %v340_v7 }
 0x4d1   :  { %4215 = vmatprep.subr.mxu0 %v4634_v36 }
 0x4d6   :  { %v4545_v8 = vpop.eup %4544 }
 0x4d7   :  { %v337_v10 = vmul.f32 %v4545_v8, %v4541_v62 }
 0x4d9   :  { %4208 = vmatmul.mubr.msk.f32.vlgmr.msra.gmra.mrb[0].mxu0 %vm163_vm2, %v337_v10 }
 0x4da   :  { %4216 = vmatpush3.xpose.msk.msra.mxu0 %vm163_vm2, %v494_v9  ;;  %4217 = vmatprep.mubr.msk.f32.mxu0 %vm4635_vm1, %v4634_v36 }
 0x4db   :  { %4225 = vmatprep.subr.mxu0 %v4634_v36 }
 0x4dd   :  { %4218 = vmatmul.mubr.msk.f32.vlgmr.msra.gmra.mrb[2].mxu0 %vm163_vm2, %v492_v11 }
 0x4de   :  { %4227 = vmatprep.mubr.msk.f32.mxu0 %vm4635_vm1, %v4634_v36 }
 0x573   :  { %v4804_v12 = vpop.f32.mrb[6].mxu1 }
 0x574   :  { %v4214_v13 = vpop.f32.mrb[7].mxu1 }
 0x577   :  { %v643_v17 = vpop.f32.mrb[8].mxu1 }
 0x578   :  { %v648_v19 = vmul.f32 0.35355338, %v643_v17  ;;  %v4224_v20 = vpop.f32.mrb[9].mxu1 }
 0x57a   :  { %v652_v21 = vsel %vm163_vm2, %v648_v19, -inf }
 0x57b   :  { %653 = vmax.xlane.f32.xlu0 %v652_v21 }
 0x591   :  { %747 = vrot.lane.b32.xlu0 %v4748_v39, %s4641_s15 }
 0x595   :  { %993 = vrot.lane.b32.xlu0 %v4750_v41, %s4642_s16 }
 0x599   :  { %1071 = vrot.lane.b32.xlu0 %v4748_v39, %s4642_s16 }
 0x5ac   :  { %v4813_v22 = vpop.f32.mrb[0].mxu0 }
 0x5ad   :  { %v4209_v23 = vpop.f32.mrb[1].mxu0 }
 0x5b0   :  { %v565_v24 = vpop.f32.mrb[2].mxu0 }
 0x5b1   :  { %v4219_v25 = vpop.f32.mrb[3].mxu0  ;;  %v647_v34 = vmul.f32 0.35355338, %v565_v24 }
 0x5b3   :  { %v649_v35 = vsel %vm163_vm2, %v647_v34, -inf }
 0x608   :  { %v654_v26 = vpop.xlane.xlu0 %653 }
 0x609   :  { %v656_v28 = vsub.f32 %v648_v19, %v654_v26  ;;  %v4861_v19 = vld [vmem:[%s5212_s0] sm:$0xff] }
 0x60a   :  { %v1839_v20 = vsel %vm29_vm0, %v4861_v19, 0.0 }
 0x60b   :  { %v659_v30 = vmul.f32 1.442695, %v656_v28 }
 0x60c   :  { %v748_v31 = vpop.permute.xlu0 %747 }
 0x60d   :  { %4546 = vpow2.f32 %v659_v30  ;;  %4231 = vmatpush3.msra.mxu1 %v748_v31 }
 0x60e   :  { %4245 = vmatprep.subr.mxu1 %v4634_v36 }
 0x610   :  { %v994_v43 = vpop.permute.xlu0 %993 }
 0x614   :  { %v1072_v45 = vpop.permute.xlu0 %1071 }
 0x617   :  { %v4547_v32 = vpop.eup %4546 }
 0x618   :  { %v664_v33 = vsel %vm163_vm2, %v4547_v32, 0.0 }
 0x619   :  { %665 = vadd.xlane.f32.xlu1 %v664_v33 }
 0x62a   :  { %1073 = vrot.lane.b32.xlu1 %v4748_v39, %s4639_s13 }
 0x64e   :  { %650 = vmax.xlane.f32.xlu1 %v649_v35 }
 0x6a6   :  { %v666_v38 = vpop.xlane.xlu1 %665 }
 0x6a7   :  { %4548 = vrcp.f32 %v666_v38 }
 0x6aa   :  { %v1074_v44 = vpop.permute.xlu1 %1073 }
 0x6b1   :  { %v4549_v40 = vpop.eup %4548 }
 0x6b2   :  { %v670_v42 = vmul.f32 %v4549_v40, %v4547_v32 }
 0x6b4   :  { %4233 = vmatmul.mubr.msk.f32.vlgmr.msra.gmra.mrb[10].mxu1 %vm163_vm2, %v670_v42 }
 0x6b5   :  { %4246 = vmatpush3.xpose.msk.msra.mxu1 %vm163_vm2, %v996_v37  ;;  %4247 = vmatprep.mubr.msk.f32.mxu1 %vm4635_vm1, %v4634_v36 }
 0x6b6   :  { %4250 = vmatprep.subr.mxu1 %v4634_v36 }
 0x6b8   :  { %4248 = vmatmul.mubr.msk.f32.vlgmr.msra.gmra.mrb[12].mxu1 %vm163_vm2, %v994_v43 }
 0x6b9   :  { %4251 = vmatpush3.xpose.msk.msra.mxu1 %vm163_vm2, %v1074_v44  ;;  %4252 = vmatprep.mubr.msk.f32.mxu1 %vm4635_vm1, %v4634_v36 }
 0x6ba   :  { %4260 = vmatprep.subr.mxu1 %v4634_v36 }
 0x6bc   :  { %4253 = vmatmul.mubr.msk.f32.vlgmr.msra.gmra.mrb[14].mxu1 %vm163_vm2, %v1072_v45 }
 0x6bd   :  { %4262 = vmatprep.mubr.msk.f32.mxu1 %vm4635_vm1, %v4634_v36 }
 0x6db   :  { %v651_v46 = vpop.xlane.xlu1 %650 }
 0x6dc   :  { %v655_v47 = vsub.f32 %v647_v34, %v651_v46 }
 0x6de   :  { %v657_v48 = vmul.f32 1.442695, %v655_v47 }
 0x6e0   :  { %4550 = vpow2.f32 %v657_v48 }
 0x6ea   :  { %v4551_v49 = vpop.eup %4550 }
 0x6eb   :  { %v661_v50 = vsel %vm163_vm2, %v4551_v49, 0.0 }
 0x6ec   :  { %662 = vadd.xlane.f32.xlu0 %v661_v50 }
 0x702   :  { %671 = vrot.lane.b32.xlu0 %v4750_v41, %s4641_s15 }
 0x706   :  { %909 = vrot.lane.b32.xlu0 %v4702_v14, %s4643_s17 }
 0x70a   :  { %1173 = vrot.lane.b32.xlu0 %v4750_v41, %s4644_s18 }
 0x70e   :  { %1249 = vrot.lane.b32.xlu0 %v4748_v39, %s4644_s18 }
 0x712   :  { %1414 = vrot.lane.b32.xlu0 %v4750_v41, %s4645_s19 }
 0x716   :  { %1326 = vrot.lane.b32.xlu0 %v4712_v16, %s4643_s17 }
 0x71a   :  { %1490 = vrot.lane.b32.xlu0 %v4748_v39, %s4646_s20 }
 0x739   :  { %1840 = vadd.xlane.f32.xlu0 %v1839_v20 }
 0x779   :  { %v663_v51 = vpop.xlane.xlu0 %662 }
 0x77a   :  { %4552 = vrcp.f32 %v663_v51 }
 0x77d   :  { %v672_v52 = vpop.permute.xlu0 %671 }
 0x77e   :  { %4226 = vmatpush3.msra.mxu0 %v672_v52 }
 0x781   :  { %v910_v14 = vpop.permute.xlu0 %909 }
 0x784   :  { %v4553_v53 = vpop.eup %4552 }
 0x785   :  { %v669_v54 = vmul.f32 %v4553_v53, %v4551_v49  ;;  %v1174_v55 = vpop.permute.xlu0 %1173 }
 0x787   :  { %4228 = vmatmul.mubr.msk.f32.vlgmr.msra.gmra.mrb[4].mxu0 %vm163_vm2, %v669_v54  ;;  %v819_v56 = vpop.f32.mrb[10].mxu1 }
 0x788   :  { %v4234_v57 = vpop.f32.mrb[11].mxu1 }
 0x789   :  { %v1250_v58 = vpop.permute.xlu0 %1249 }
 0x78a   :  { %4261 = vmatpush3.msra.mxu1 %v1250_v58 }
 0x78b   :  { %v1067_v59 = vpop.f32.mrb[12].mxu1  ;;  %4270 = vmatprep.subr.mxu1 %v4634_v36 }
 0x78c   :  { %v1149_v16 = vmul.f32 0.35355338, %v1067_v59  ;;  %v4249_v60 = vpop.f32.mrb[13].mxu1 }
 0x78d   :  { %v1415_v26 = vpop.permute.xlu0 %1414 }
 0x78e   :  { %v1151_v61 = vsel %vm163_vm2, %v1149_v16, -inf }
 0x78f   :  { %1152 = vmax.xlane.f32.xlu1 %v1151_v61  ;;  %v1145_v62 = vpop.f32.mrb[14].mxu1 }
 0x790   :  { %v1150_v63 = vmul.f32 0.35355338, %v1145_v62  ;;  %v4254_v2 = vpop.f32.mrb[15].mxu1 }
 0x791   :  { %v1327_v32 = vpop.permute.xlu0 %1326 }
 0x792   :  { %v1154_v3 = vsel %vm163_vm2, %v1150_v63, -inf }
 0x793   :  { %1155 = vmax.xlane.f32.xlu1 %v1154_v3 }
 0x795   :  { %v1491_v35 = vpop.permute.xlu0 %1490 }
 0x7c6   :  { %v1841_v37 = vpop.xlane.xlu0 %1840 }
 0x7c7   :  { %v1845_v38 = vmul.f32 0.03125, %v1841_v37 }
 0x7c9   :  { %v1847_v43 = vsub.f32 %v4861_v19, %v1845_v38 }
 0x7cb   :  { %v1849_v48 = vmul.f32 %v1847_v43, %v1847_v43 }
 0x7cd   :  { %v1851_v52 = vsel %vm29_vm0, %v1849_v48, 0.0 }
 0x81c   :  { %v1153_v4 = vpop.xlane.xlu1 %1152 }
 0x81d   :  { %v1157_v5 = vsub.f32 %v1149_v16, %v1153_v4 }
 0x81f   :  { %v1159_v6 = vmul.f32 1.442695, %v1157_v5  ;;  %v4919_v5 = vld [vmem:[%s5214_s2 + $0x20] sm:$0xff] }
 0x820   :  { %v1156_v7 = vpop.xlane.xlu1 %1155 }
 0x821   :  { %4554 = vpow2.f32 %v1159_v6  ;;  %v1158_v8 = vsub.f32 %v1150_v63, %v1156_v7 }
 0x823   :  { %v1161_v9 = vmul.f32 1.442695, %v1158_v8 }
 0x825   :  { %4556 = vpow2.f32 %v1161_v9 }
 0x82b   :  { %v4555_v10 = vpop.eup %4554 }
 0x82c   :  { %v1163_v11 = vsel %vm163_vm2, %v4555_v10, 0.0 }
 0x82d   :  { %1164 = vadd.xlane.f32.xlu1 %v1163_v11 }
 0x82f   :  { %v4557_v13 = vpop.eup %4556 }
 0x830   :  { %v1166_v17 = vsel %vm163_vm2, %v4557_v13, 0.0 }
 0x831   :  { %1167 = vadd.xlane.f32.xlu1 %v1166_v17  ;;  %v4932_v17 = vld [vmem:[%s5214_s2 + $0x50] sm:$0xff] }
 0x842   :  { %824 = vrot.lane.b32.xlu1 %v4707_v15, %s4643_s17 }
 0x846   :  { %1412 = vrot.lane.b32.xlu1 %v4750_v41, %s4646_s20 }
 0x84a   :  { %1492 = vrot.lane.b32.xlu1 %v4748_v39, %s4645_s19 }
 0x85a   :  { %v743_v21 = vpop.f32.mrb[4].mxu0 }
 0x85b   :  { %v4229_v23 = vpop.f32.mrb[5].mxu0  ;;  %4237 = vmatprep.mubr.msk.f32.mxu0 %vm163_vm2, %v743_v21 }
 0x8ba   :  { %v1165_v15 = vpop.xlane.xlu1 %1164 }
 0x8be   :  { %v1168_v24 = vpop.xlane.xlu1 %1167 }
 0x8bf   :  { %4558 = vrcp.f32 %v1168_v24 }
 0x8c0   :  { %4560 = vrcp.f32 %v1165_v15 }
 0x8c2   :  { %v825_v25 = vpop.permute.xlu1 %824 }
 0x8c3   :  { %4235 = vmatprep.subr.mxu0 %v825_v25 }
 0x8c4   :  { %4236 = vmatpush3.msra.mxu0 %v825_v25 }
 0x8c5   :  { %4238 = vmatmul.mubr.msk.f32.vlgmr.msra.gmra.mrb[6].mxu0 %vm163_vm2, %v819_v56  ;;  %4240 = vmatprep.subr.mxu0 %v910_v14 }
 0x8c6   :  { %4242 = vmatprep.mubr.msk.f32.mxu0 %vm163_vm2, %v4813_v22  ;;  %4241 = vmatpush3.msra.mxu0 %v910_v14  ;;  %v1413_v33 = vpop.permute.xlu1 %1412 }
 0x8c7   :  { %4255 = vmatprep.subr.mxu0 %v4634_v36 }
 0x8c9   :  { %v4559_v28 = vpop.eup %4558 }
 0x8ca   :  { %v1172_v30 = vmul.f32 %v4559_v28, %v4557_v13  ;;  %v4561_v31 = vpop.eup %4560  ;;  %v1493_v50 = vpop.permute.xlu1 %1492  ;;  %v4927_v13 = vld [vmem:[%s5214_s2 + $0x38] sm:$0xff] }
 0x8cb   :  { %v1171_v22 = vmul.f32 %v4561_v31, %v4555_v10  ;;  %v4459_v23 = vpack.c.bf16 %v4932_v17, %v4927_v13 }
 0x8cc   :  { %4263 = vmatmul.mubr.msk.f32.vlgmr.msra.gmra.mrb[16].mxu1 %vm163_vm2, %v1172_v30 }
 0x8cd   :  { %4271 = vmatpush3.xpose.msk.msra.mxu1 %vm163_vm2, %v1415_v26  ;;  %4243 = vmatmul.mubr.msk.f32.vlgmr.msra.gmra.mrb[6].mxu0 %vm163_vm2, %v4804_v12  ;;  %v4887_v12 = vld [vmem:[%s5212_s0 + $0x8] sm:$0xff]  ;;  %s4647_s0 = smov 40  }
 0x8ce   :  { %4256 = vmatpush3.msra.mxu0 %v1174_v55  ;;  %4272 = vmatprep.mubr.msk.f32.mxu1 %vm4635_vm1, %v4634_v36  ;;  %v1842_v34 = vsel %vm29_vm0, %v4887_v12, 0.0 }
 0x8cf   :  { %4257 = vmatprep.mubr.msk.f32.mxu0 %vm4635_vm1, %v4634_v36  ;;  %4265 = vmatprep.subr.mxu0 %v1327_v32 }
 0x8d0   :  { %4273 = vmatmul.mubr.msk.f32.vlgmr.msra.gmra.mrb[18].mxu1 %vm163_vm2, %v1413_v33  ;;  %4280 = vmatprep.subr.mxu1 %v4634_v36 }
 0x8d1   :  { %4258 = vmatmul.mubr.msk.f32.vlgmr.msra.gmra.mrb[8].mxu0 %vm163_vm2, %v1171_v22  ;;  %4282 = vmatprep.mubr.msk.f32.mxu1 %vm4635_vm1, %v4634_v36 }
 0x8d2   :  { %4266 = vmatpush3.msra.mxu0 %v1327_v32  ;;  %1843 = vadd.xlane.f32.xlu0 %v1842_v34 }
 0x8d3   :  { %4275 = vmatprep.subr.mxu0 %v4634_v36 }
 0x95f   :  { %v1844_v57 = vpop.xlane.xlu0 %1843 }
 0x960   :  { %v1846_v58 = vmul.f32 0.03125, %v1844_v57 }
 0x962   :  { %v1848_v59 = vsub.f32 %v4887_v12, %v1846_v58 }
 0x964   :  { %v1850_v62 = vmul.f32 %v1848_v59, %v1848_v59 }
 0x966   :  { %v1854_v2 = vsel %vm29_vm0, %v1850_v62, 0.0 }
 0x99f   :  { %v1321_v40 = vpop.f32.mrb[16].mxu1 }
 0x9a0   :  { %v4264_v42 = vpop.f32.mrb[17].mxu1 }
 0x9a3   :  { %v1486_v44 = vpop.f32.mrb[18].mxu1 }
 0x9a4   :  { %v1568_v45 = vmul.f32 0.35355338, %v1486_v44  ;;  %v1245_v46 = vpop.f32.mrb[8].mxu0  ;;  %v4274_v47 = vpop.f32.mrb[19].mxu1 }
 0x9a5   :  { %v4259_v49 = vpop.f32.mrb[9].mxu0  ;;  %4267 = vmatprep.mubr.msk.f32.mxu0 %vm163_vm2, %v1245_v46 }
 0x9a6   :  { %4268 = vmatmul.mubr.msk.f32.vlgmr.msra.gmra.mrb[6].mxu0 %vm163_vm2, %v1321_v40  ;;  %v1570_v51 = vsel %vm163_vm2, %v1568_v45, -inf }
 0x9a7   :  { %4276 = vmatpush3.xpose.msk.msra.mxu0 %vm163_vm2, %v1493_v50  ;;  %1571 = vmax.xlane.f32.xlu1 %v1570_v51  ;;  %v4529_v50 = vpack.i.bf16 %v4932_v17, %v4927_v13 }
 0x9a8   :  { %4277 = vmatprep.mubr.msk.f32.mxu0 %vm4635_vm1, %v4634_v36  ;;  %4285 = vmatprep.subr.mxu0 %v4634_v36 }
 0x9aa   :  { %4278 = vmatmul.mubr.msk.f32.vlgmr.msra.gmra.mrb[10].mxu0 %vm163_vm2, %v1491_v35 }
 0x9ab   :  { %1852 = vadd.xlane.f32.xlu1 %v1851_v52  ;;  %4287 = vmatprep.mubr.msk.f32.mxu0 %vm4635_vm1, %v4634_v36 }
 0xa34   :  { %v1572_v14 = vpop.xlane.xlu1 %1571 }
 0xa35   :  { %v1576_v53 = vsub.f32 %v1568_v45, %v1572_v14 }
 0xa37   :  { %v1578_v54 = vmul.f32 1.442695, %v1576_v53 }
 0xa38   :  { %v1853_v3 = vpop.xlane.xlu1 %1852 }
 0xa39   :  { %4562 = vpow2.f32 %v1578_v54  ;;  %v1857_v4 = vmul.f32 0.03125, %v1853_v3 }
 0xa43   :  { %v4563_v55 = vpop.eup %4562 }
 0xa44   :  { %v1582_v56 = vsel %vm163_vm2, %v4563_v55, 0.0 }
 0xa45   :  { %1583 = vadd.xlane.f32.xlu1 %v1582_v56 }
 0xa56   :  { %1592 = vrot.lane.b32.xlu1 %v4750_v41, %s4647_s0  ;;  %v1859_v41 = vadd.f32 1e-05, %v1857_v4 }
 0xa58   :  { %4564 = vrsqrt.f32 %v1859_v41  ;;  %v4014_v41 = vld [vmem:[%s5216_s4 + $0x5] ss:$0 sm:$0xff] }
 0xa5a   :  { %1745 = vrot.lane.b32.xlu1 %v4719_v18, %s4643_s17  ;;  %v4914_v18 = vld [vmem:[%s5214_s2 + $0x8] sm:$0xff] }
 0xa5b   :  { %v4455_v8 = vpack.c.bf16 %v4919_v5, %v4914_v18  ;;  %v4524_v49 = vpack.i.bf16 %v4919_v5, %v4914_v18 }
 0xa62   :  { %v4565_v7 = vpop.eup %4564 }
 0xa63   :  { %v1863_v10 = vmul.f32 %v4565_v7, %v1847_v43 }
 0xa65   :  { %v1865_v11 = vmul.f32 %v4726_v27, %v1863_v10 }
 0xa67   :  { %v1867_v15 = vadd.f32 %v4731_v29, %v1865_v11 }
 0xa7d   :  { %v1564_v16 = vpop.f32.mrb[10].mxu0 }
 0xa7e   :  { %v1569_v60 = vmul.f32 0.35355338, %v1564_v16  ;;  %v4279_v61 = vpop.f32.mrb[11].mxu0 }
 0xa80   :  { %v1573_v63 = vsel %vm163_vm2, %v1569_v60, -inf }
 0xa81   :  { %1574 = vmax.xlane.f32.xlu0 %v1573_v63 }
 0xa85   :  { %1855 = vadd.xlane.f32.xlu0 %v1854_v2 }
 0xad2   :  { %v1584_v6 = vpop.xlane.xlu1 %1583 }
 0xad3   :  { %4566 = vrcp.f32 %v1584_v6 }
 0xad6   :  { %v1593_v9 = vpop.permute.xlu1 %1592 }
 0xad7   :  { %4281 = vmatpush3.msra.mxu1 %v1593_v9 }
 0xad8   :  { %4456 = vmatprep.subr.bf16.mxu1 %v4455_v8 }
 0xada   :  { %v1746_v40 = vpop.permute.xlu1 %1745 }
 0xadd   :  { %v4567_v20 = vpop.eup %4566 }
 0xade   :  { %v1590_v21 = vmul.f32 %v4567_v20, %v4563_v55 }
 0xae0   :  { %4283 = vmatmul.mubr.msk.f32.vlgmr.msra.gmra.mrb[20].mxu1 %vm163_vm2, %v1590_v21 }
 0xae1   :  { %4303 = vmatprep.mubr.msk.f32.mxu1 %vm29_vm0, %v1867_v15  ;;  %4458 = vmatpush3.bf16.msra.mxu1 %v4455_v8 }
 0xae2   :  { %4460 = vmatprep.subr.bf16.mxu1 %v4459_v23 }
 0xae5   :  { %4462 = vmatpush3.bf16.msra.mxu1 %v4459_v23 }
 0xae6   :  { %4317 = vmatprep.subr.mxu1 %v4634_v36 }
 0xb0e   :  { %v1575_v24 = vpop.xlane.xlu0 %1574 }
 0xb0f   :  { %v1577_v25 = vsub.f32 %v1569_v60, %v1575_v24 }
 0xb11   :  { %v1580_v26 = vmul.f32 1.442695, %v1577_v25 }
 0xb12   :  { %v1856_v28 = vpop.xlane.xlu0 %1855 }
 0xb13   :  { %4568 = vpow2.f32 %v1580_v26  ;;  %v1858_v30 = vmul.f32 0.03125, %v1856_v28 }
 0xb15   :  { %v1860_v31 = vadd.f32 1e-05, %v1858_v30 }
 0xb17   :  { %4570 = vrsqrt.f32 %v1860_v31 }
 0xb1d   :  { %v4569_v32 = vpop.eup %4568 }
 0xb1e   :  { %v1585_v22 = vsel %vm163_vm2, %v4569_v32, 0.0 }
 0xb1f   :  { %1586 = vadd.xlane.f32.xlu0 %v1585_v22  ;;  %v4018_v22 = vld [vmem:[%s5216_s4 + $0x7] ss:$0 sm:$0xff] }
 0xb21   :  { %v4571_v33 = vpop.eup %4570 }
 0xb22   :  { %v1864_v34 = vmul.f32 %v4571_v33, %v1848_v59 }
 0xb24   :  { %v1866_v35 = vmul.f32 %v4726_v27, %v1864_v34 }
 0xb26   :  { %v1868_v37 = vadd.f32 %v4731_v29, %v1866_v35  ;;  %v4015_v29 = vld [vmem:[%s5216_s4 + $0x6] ss:$0 sm:$0xff] }
 0xb28   :  { %4304 = vmatmul.mubr.msk.f32.vlgmr.msra.gmra.mrb[22].mxu1 %vm29_vm0, %v1868_v37 }
 0xb29   :  { %4319 = vmatprep.mubr.msk.f32.mxu1 %vm4635_vm1, %v4634_v36 }
 0xb35   :  { %1668 = vrot.lane.b32.xlu0 %v4748_v39, %s4647_s0 }
 0xb39   :  { %4525 = vrot.lane.b32.xlu0 %v4524_v49, %s4640_s14 }
 0xbac   :  { %v1587_v38 = vpop.xlane.xlu0 %1586 }
 0xbad   :  { %4572 = vrcp.f32 %v1587_v38 }
 0xbb0   :  { %v1669_v42 = vpop.permute.xlu0 %1668 }
 0xbb1   :  { %4286 = vmatpush3.msra.mxu0 %v1669_v42 }
 0xbb2   :  { %4290 = vmatprep.subr.mxu0 %v1746_v40 }
 0xbb3   :  { %v1664_v43 = vpop.f32.mrb[20].mxu1 }
 0xbb4   :  { %v4284_v44 = vpop.f32.mrb[21].mxu1  ;;  %v4526_v54 = vpop.permute.xlu0 %4525 }
 0xbb5   :  { %v4528_v56 = vunpack.i.h.bf16 %v4526_v54  ;;  %v4527_v57 = vunpack.i.l.bf16 %v4526_v54 }
 0xbb7   :  { %v4573_v45 = vpop.eup %4572  ;;  %v4463_v16 = vpack.c.bf16 %v4528_v56, %v4527_v57 }
 0xbb8   :  { %v1591_v27 = vmul.f32 %v4573_v45, %v4569_v32 }
 0xbba   :  { %4288 = vmatmul.mubr.msk.f32.vlgmr.msra.gmra.mrb[12].mxu0 %vm163_vm2, %v1591_v27 }
 0xbbb   :  { %4292 = vmatprep.mubr.msk.f32.mxu0 %vm163_vm2, %v1664_v43  ;;  %4291 = vmatpush3.msra.mxu0 %v1746_v40 }
 0xbbc   :  { %4464 = vmatprep.subr.bf16.mxu0 %v4463_v16 }
 0xbfb   :  { %v4305_v39 = vpop.f32.mrb[22].mxu1 }
 0xbfc   :  { %v1950_v46 = vpop.f32.mrb[23].mxu1  ;;  %v4957_v48 = vadd.f32 %v4305_v39, %v4015_v29 }
 0xbfd   :  { %v4953_v47 = vadd.f32 %v4015_v29, %v1950_v46 }
 0xbff   :  { %2063 = vrot.lane.b32.xlu1 %v4953_v47, %s4636_s10 }
 0xc03   :  { %2140 = vrot.lane.b32.xlu1 %v4957_v48, %s4636_s10 }
 0xc07   :  { %4530 = vrot.lane.b32.xlu1 %v4529_v50, %s4640_s14 }
 0xc71   :  { %v2064_v51 = vpop.permute.xlu1 %2063 }
 0xc72   :  { %4318 = vmatpush3.xpose.msk.msra.mxu1 %vm163_vm2, %v2064_v51 }
 0xc73   :  { %4322 = vmatprep.subr.mxu1 %v4634_v36 }
 0xc75   :  { %4320 = vmatmul.mubr.msk.f32.vlgmr.msra.gmra.mrb[24].mxu1 %vm163_vm2, %v4953_v47  ;;  %v2141_v52 = vpop.permute.xlu1 %2140 }
 0xc76   :  { %4323 = vmatpush3.xpose.msk.msra.mxu1 %vm163_vm2, %v2141_v52  ;;  %4324 = vmatprep.mubr.msk.f32.mxu1 %vm4635_vm1, %v4634_v36 }
 0xc77   :  { %4332 = vmatprep.subr.mxu1 %v4634_v36 }
 0xc79   :  { %4325 = vmatmul.mubr.msk.f32.vlgmr.msra.gmra.mrb[26].mxu1 %vm163_vm2, %v4957_v48  ;;  %v4531_v55 = vpop.permute.xlu1 %4530 }
 0xc7a   :  { %4334 = vmatprep.mubr.msk.f32.mxu1 %vm4635_vm1, %v4634_v36  ;;  %v4533_v58 = vunpack.i.h.bf16 %v4531_v55  ;;  %v4532_v59 = vunpack.i.l.bf16 %v4531_v55 }
 0xc7c   :  { %v4467_v60 = vpack.c.bf16 %v4533_v58, %v4532_v59 }
 0xc8d   :  { %v1740_v14 = vpop.f32.mrb[12].mxu0 }
 0xc8e   :  { %v4289_v53 = vpop.f32.mrb[13].mxu0  ;;  %4293 = vmatmul.mubr.msk.f32.vlgmr.msra.gmra.mrb[6].mxu0 %vm163_vm2, %v1740_v14 }
 0xc8f   :  { %4466 = vmatpush3.bf16.msra.mxu0 %v4463_v16 }
 0xc90   :  { %4468 = vmatprep.subr.bf16.mxu0 %v4467_v60 }
 0xc93   :  { %4470 = vmatpush3.bf16.msra.mxu0 %v4467_v60 }
 0xc94   :  { %4327 = vmatprep.subr.mxu0 %v4634_v36 }
 0xd48   :  { %v2135_v61 = vpop.f32.mrb[24].mxu1 }
 0xd49   :  { %v4321_v62 = vpop.f32.mrb[25].mxu1  ;;  %v2216_v20 = vmul.f32 0.35355338, %v2135_v61 }
 0xd4b   :  { %v2218_v21 = vsel %vm163_vm2, %v2216_v20, -inf }
 0xd4c   :  { %v2212_v63 = vpop.f32.mrb[26].mxu1 }
 0xd4d   :  { %v2217_v2 = vmul.f32 0.35355338, %v2212_v63  ;;  %v4326_v3 = vpop.f32.mrb[27].mxu1 }
 0xd4f   :  { %v2221_v4 = vsel %vm163_vm2, %v2217_v2, -inf }
 0xd50   :  { %2222 = vmax.xlane.f32.xlu0 %v2221_v4 }
 0xd61   :  { %v4294_v6 = vpop.f32.mrb[6].mxu0 }
 0xd62   :  { %v1836_v7 = vadd.f32 %v4294_v6, %v4014_v41  ;;  %v1820_v8 = vpop.f32.mrb[7].mxu0 }
 0xd63   :  { %v1835_v9 = vadd.f32 %v4014_v41, %v1820_v8 }
 0xd64   :  { %v1838_v11 = vadd.f32 %v1836_v7, %v4689_v1 }
 0xd65   :  { %v1837_v10 = vadd.f32 %v1835_v9, %v4684_v0 }
 0xd66   :  { %2466 = vrot.lane.b32.xlu0 %v4957_v48, %s4637_s11 }
 0xd67   :  { %4314 = vmatprep.mubr.msk.f32.mxu0 %vm29_vm0, %v1837_v10 }
 0xd68   :  { %4315 = vmatmul.mubr.msk.f32.vlgmr.msra.gmra.mrb[14].mxu0 %vm29_vm0, %v1838_v11 }
 0xd69   :  { %4329 = vmatprep.mubr.msk.f32.mxu0 %vm4635_vm1, %v4634_v36 }
 0xd85   :  { %2219 = vmax.xlane.f32.xlu0 %v2218_v21 }
 0xd9b   :  { %2388 = vrot.lane.b32.xlu0 %v4953_v47, %s4637_s11 }
 0xddd   :  { %v2223_v0 = vpop.xlane.xlu0 %2222 }
 0xdde   :  { %v2225_v23 = vsub.f32 %v2217_v2, %v2223_v0 }
 0xde0   :  { %v2228_v1 = vmul.f32 1.442695, %v2225_v23 }
 0xde1   :  { %v2467_v25 = vpop.permute.xlu0 %2466 }
 0xde2   :  { %4574 = vpow2.f32 %v2228_v1 }
 0xdec   :  { %v4575_v15 = vpop.eup %4574 }
 0xded   :  { %v2233_v24 = vsel %vm163_vm2, %v4575_v15, 0.0 }
 0xdee   :  { %2234 = vadd.xlane.f32.xlu1 %v2233_v24 }
 0xdff   :  { %2464 = vrot.lane.b32.xlu1 %v4957_v48, %s4638_s12 }
 0xe12   :  { %v2220_v26 = vpop.xlane.xlu0 %2219 }
 0xe13   :  { %v2224_v28 = vsub.f32 %v2216_v20, %v2220_v26 }
 0xe15   :  { %v2226_v30 = vmul.f32 1.442695, %v2224_v28 }
 0xe16   :  { %v2389_v29 = vpop.permute.xlu0 %2388 }
 0xe17   :  { %4576 = vpow2.f32 %v2226_v30 }
 0xe21   :  { %v4577_v31 = vpop.eup %4576 }
 0xe22   :  { %v2230_v32 = vsel %vm163_vm2, %v4577_v31, 0.0 }
 0xe23   :  { %2231 = vadd.xlane.f32.xlu1 %v2230_v32 }
 0xe34   :  { %2386 = vrot.lane.b32.xlu1 %v4953_v47, %s4638_s12 }
 0xe38   :  { %2890 = vrot.lane.b32.xlu1 %v4953_v47, %s4639_s13 }
 0xe3b   :  { %v4316_v33 = vpop.f32.mrb[14].mxu0 }
 0xe3c   :  { %v5007_v34 = vadd.f32 %v4316_v33, %v4018_v22  ;;  %v2052_v35 = vpop.f32.mrb[15].mxu0 }
 0xe3d   :  { %v5009_v37 = vadd.f32 %v4018_v22, %v2052_v35 }
 0xe3e   :  { %4333 = vmatpush3.msra.mxu1 %v5007_v34 }
 0xe3f   :  { %4328 = vmatpush3.msra.mxu0 %v5009_v37  ;;  %4342 = vmatprep.subr.mxu1 %v4634_v36 }
 0xe40   :  { %4337 = vmatprep.subr.mxu0 %v4634_v36 }
 0xe7b   :  { %v2235_v38 = vpop.xlane.xlu1 %2234 }
 0xe7c   :  { %4578 = vrcp.f32 %v2235_v38 }
 0xe7f   :  { %v2465_v43 = vpop.permute.xlu1 %2464 }
 0xe86   :  { %v4579_v40 = vpop.eup %4578 }
 0xe87   :  { %v2239_v42 = vmul.f32 %v4579_v40, %v4575_v15 }
 0xe89   :  { %4335 = vmatmul.mubr.msk.f32.vlgmr.msra.gmra.mrb[28].mxu1 %vm163_vm2, %v2239_v42 }
 0xe8a   :  { %4343 = vmatpush3.xpose.msk.msra.mxu1 %vm163_vm2, %v2467_v25  ;;  %4344 = vmatprep.mubr.msk.f32.mxu1 %vm4635_vm1, %v4634_v36 }
 0xe8b   :  { %4352 = vmatprep.subr.mxu1 %v4634_v36 }
 0xe8d   :  { %4345 = vmatmul.mubr.msk.f32.vlgmr.msra.gmra.mrb[30].mxu1 %vm163_vm2, %v2465_v43 }
 0xe8e   :  { %4354 = vmatprep.mubr.msk.f32.mxu1 %vm4635_vm1, %v4634_v36 }
 0xeb0   :  { %v2232_v44 = vpop.xlane.xlu1 %2231 }
 0xeb1   :  { %4580 = vrcp.f32 %v2232_v44 }
 0xeb4   :  { %v2387_v39 = vpop.permute.xlu1 %2386 }
 0xeb8   :  { %v2891_v2 = vpop.permute.xlu1 %2890 }
 0xebb   :  { %v4581_v45 = vpop.eup %4580 }
 0xebc   :  { %v2238_v27 = vmul.f32 %v4581_v45, %v4577_v31 }
 0xebe   :  { %4330 = vmatmul.mubr.msk.f32.vlgmr.msra.gmra.mrb[16].mxu0 %vm163_vm2, %v2238_v27 }
 0xebf   :  { %4338 = vmatpush3.xpose.msk.msra.mxu0 %vm163_vm2, %v2389_v29  ;;  %4339 = vmatprep.mubr.msk.f32.mxu0 %vm4635_vm1, %v4634_v36 }
 0xec0   :  { %4347 = vmatprep.subr.mxu0 %v4634_v36 }
 0xec2   :  { %4340 = vmatmul.mubr.msk.f32.vlgmr.msra.gmra.mrb[18].mxu0 %vm163_vm2, %v2387_v39 }
 0xec3   :  { %4349 = vmatprep.mubr.msk.f32.mxu0 %vm4635_vm1, %v4634_v36 }
 0xf5c   :  { %v5031_v46 = vpop.f32.mrb[28].mxu1 }
 0xf5d   :  { %v4336_v49 = vpop.f32.mrb[29].mxu1 }
 0xf60   :  { %v2538_v50 = vpop.f32.mrb[30].mxu1 }
 0xf61   :  { %v2543_v51 = vmul.f32 0.35355338, %v2538_v50  ;;  %v4346_v52 = vpop.f32.mrb[31].mxu1 }
 0xf63   :  { %v2547_v14 = vsel %vm163_vm2, %v2543_v51, -inf }
 0xf64   :  { %2548 = vmax.xlane.f32.xlu0 %v2547_v14 }
 0xf7a   :  { %2644 = vrot.lane.b32.xlu0 %v5007_v34, %s4638_s12 }
 0xf7e   :  { %2888 = vrot.lane.b32.xlu0 %v4953_v47, %s4642_s16 }
 0xf82   :  { %2966 = vrot.lane.b32.xlu0 %v4957_v48, %s4642_s16 }
 0xf91   :  { %v5040_v53 = vpop.f32.mrb[16].mxu0 }
 0xf92   :  { %v4331_v54 = vpop.f32.mrb[17].mxu0 }
 0xf95   :  { %v2460_v55 = vpop.f32.mrb[18].mxu0 }
 0xf96   :  { %v4341_v56 = vpop.f32.mrb[19].mxu0  ;;  %v2542_v62 = vmul.f32 0.35355338, %v2460_v55 }
 0xf98   :  { %v2544_v63 = vsel %vm163_vm2, %v2542_v62, -inf }
 0xff1   :  { %v2549_v57 = vpop.xlane.xlu0 %2548 }
 0xff2   :  { %v2551_v58 = vsub.f32 %v2543_v51, %v2549_v57 }
 0xff4   :  { %v2554_v59 = vmul.f32 1.442695, %v2551_v58 }
 0xff5   :  { %v2645_v16 = vpop.permute.xlu0 %2644 }
 0xff6   :  { %4582 = vpow2.f32 %v2554_v59  ;;  %4353 = vmatpush3.msra.mxu1 %v2645_v16 }
 0xff7   :  { %4367 = vmatprep.subr.mxu1 %v4634_v36 }
 0xff9   :  { %v2889_v6 = vpop.permute.xlu0 %2888 }
 0xffd   :  { %v2967_v8 = vpop.permute.xlu0 %2966 }
0x1000   :  { %v4583_v60 = vpop.eup %4582 }
0x1001   :  { %v2559_v61 = vsel %vm163_vm2, %v4583_v60, 0.0 }
0x1002   :  { %2560 = vadd.xlane.f32.xlu1 %v2559_v61 }
0x1013   :  { %2968 = vrot.lane.b32.xlu1 %v4957_v48, %s4639_s13 }
0x1037   :  { %2545 = vmax.xlane.f32.xlu1 %v2544_v63 }
0x108f   :  { %v2561_v3 = vpop.xlane.xlu1 %2560 }
0x1090   :  { %4584 = vrcp.f32 %v2561_v3 }
0x1093   :  { %v2969_v7 = vpop.permute.xlu1 %2968 }
0x109a   :  { %v4585_v4 = vpop.eup %4584 }
0x109b   :  { %v2565_v41 = vmul.f32 %v4585_v4, %v4583_v60 }
0x109d   :  { %4355 = vmatmul.mubr.msk.f32.vlgmr.msra.gmra.mrb[32].mxu1 %vm163_vm2, %v2565_v41 }
0x109e   :  { %4368 = vmatpush3.xpose.msk.msra.mxu1 %vm163_vm2, %v2891_v2  ;;  %4369 = vmatprep.mubr.msk.f32.mxu1 %vm4635_vm1, %v4634_v36 }
0x109f   :  { %4372 = vmatprep.subr.mxu1 %v4634_v36 }
0x10a1   :  { %4370 = vmatmul.mubr.msk.f32.vlgmr.msra.gmra.mrb[34].mxu1 %vm163_vm2, %v2889_v6 }
0x10a2   :  { %4373 = vmatpush3.xpose.msk.msra.mxu1 %vm163_vm2, %v2969_v7  ;;  %4374 = vmatprep.mubr.msk.f32.mxu1 %vm4635_vm1, %v4634_v36 }
0x10a3   :  { %4382 = vmatprep.subr.mxu1 %v4634_v36 }
0x10a5   :  { %4375 = vmatmul.mubr.msk.f32.vlgmr.msra.gmra.mrb[36].mxu1 %vm163_vm2, %v2967_v8 }
0x10a6   :  { %4384 = vmatprep.mubr.msk.f32.mxu1 %vm4635_vm1, %v4634_v36 }
0x10c4   :  { %v2546_v9 = vpop.xlane.xlu1 %2545 }
0x10c5   :  { %v2550_v10 = vsub.f32 %v2542_v62, %v2546_v9 }
0x10c7   :  { %v2552_v11 = vmul.f32 1.442695, %v2550_v10 }
0x10c9   :  { %4586 = vpow2.f32 %v2552_v11 }
0x10d3   :  { %v4587_v20 = vpop.eup %4586 }
0x10d4   :  { %v2556_v21 = vsel %vm163_vm2, %v4587_v20, 0.0 }
0x10d5   :  { %2557 = vadd.xlane.f32.xlu0 %v2556_v21 }
0x10eb   :  { %2567 = vrot.lane.b32.xlu0 %v5009_v37, %s4638_s12 }
0x10ef   :  { %2804 = vrot.lane.b32.xlu0 %v4914_v18, %s4643_s17 }
0x10f3   :  { %3068 = vrot.lane.b32.xlu0 %v5009_v37, %s4642_s16 }
0x10f7   :  { %3144 = vrot.lane.b32.xlu0 %v5007_v34, %s4642_s16 }
0x10fb   :  { %3220 = vrot.lane.b32.xlu0 %v4927_v13, %s4643_s17 }
0x10ff   :  { %3386 = vrot.lane.b32.xlu0 %v4957_v48, %s4645_s19 }
0x1103   :  { %3384 = vrot.lane.b32.xlu0 %v4957_v48, %s4646_s20 }
0x1162   :  { %v2558_v0 = vpop.xlane.xlu0 %2557 }
0x1163   :  { %4588 = vrcp.f32 %v2558_v0 }
0x1166   :  { %v2568_v23 = vpop.permute.xlu0 %2567 }
0x1167   :  { %4348 = vmatpush3.msra.mxu0 %v2568_v23 }
0x116a   :  { %v2805_v18 = vpop.permute.xlu0 %2804 }
0x116d   :  { %v4589_v1 = vpop.eup %4588 }
0x116e   :  { %v2564_v15 = vmul.f32 %v4589_v1, %v4587_v20  ;;  %v3069_v24 = vpop.permute.xlu0 %3068 }
0x1170   :  { %4350 = vmatmul.mubr.msk.f32.vlgmr.msra.gmra.mrb[20].mxu0 %vm163_vm2, %v2564_v15  ;;  %v2716_v25 = vpop.f32.mrb[32].mxu1 }
0x1171   :  { %v4356_v26 = vpop.f32.mrb[33].mxu1 }
0x1172   :  { %v3145_v28 = vpop.permute.xlu0 %3144 }
0x1173   :  { %4383 = vmatpush3.msra.mxu1 %v3145_v28 }
0x1174   :  { %v2962_v13 = vpop.f32.mrb[34].mxu1  ;;  %4392 = vmatprep.subr.mxu1 %v4634_v36 }
0x1175   :  { %v3044_v30 = vmul.f32 0.35355338, %v2962_v13  ;;  %v4371_v31 = vpop.f32.mrb[35].mxu1 }
0x1176   :  { %v3221_v57 = vpop.permute.xlu0 %3220 }
0x1177   :  { %v3046_v48 = vsel %vm163_vm2, %v3044_v30, -inf }
0x1178   :  { %v3040_v32 = vpop.f32.mrb[36].mxu1  ;;  %3047 = vmax.xlane.f32.xlu1 %v3046_v48 }
0x1179   :  { %v3045_v22 = vmul.f32 0.35355338, %v3040_v32  ;;  %v4376_v33 = vpop.f32.mrb[37].mxu1 }
0x117a   :  { %v3387_v16 = vpop.permute.xlu0 %3386 }
0x117b   :  { %v3049_v35 = vsel %vm163_vm2, %v3045_v22, -inf }
0x117c   :  { %3050 = vmax.xlane.f32.xlu1 %v3049_v35 }
0x117e   :  { %v3385_v4 = vpop.permute.xlu0 %3384 }
0x1205   :  { %v3048_v38 = vpop.xlane.xlu1 %3047 }
0x1206   :  { %v3052_v40 = vsub.f32 %v3044_v30, %v3048_v38 }
0x1208   :  { %v3054_v42 = vmul.f32 1.442695, %v3052_v40 }
0x1209   :  { %v3051_v43 = vpop.xlane.xlu1 %3050 }
0x120a   :  { %4590 = vpow2.f32 %v3054_v42  ;;  %v3053_v44 = vsub.f32 %v3045_v22, %v3051_v43 }
0x120c   :  { %v3056_v45 = vmul.f32 1.442695, %v3053_v44 }
0x120e   :  { %4592 = vpow2.f32 %v3056_v45 }
0x1214   :  { %v4591_v27 = vpop.eup %4590 }
0x1215   :  { %v3058_v29 = vsel %vm163_vm2, %v4591_v27, 0.0 }
0x1216   :  { %3059 = vadd.xlane.f32.xlu1 %v3058_v29 }
0x1218   :  { %v4593_v39 = vpop.eup %4592 }
0x1219   :  { %v3061_v49 = vsel %vm163_vm2, %v4593_v39, 0.0 }
0x121a   :  { %3062 = vadd.xlane.f32.xlu1 %v3061_v49 }
0x122b   :  { %2720 = vrot.lane.b32.xlu1 %v4919_v5, %s4643_s17 }
0x122f   :  { %3308 = vrot.lane.b32.xlu1 %v4953_v47, %s4645_s19 }
0x1233   :  { %3306 = vrot.lane.b32.xlu1 %v4953_v47, %s4646_s20 }
0x1243   :  { %v2639_v50 = vpop.f32.mrb[20].mxu0 }
0x1244   :  { %v4351_v51 = vpop.f32.mrb[21].mxu0  ;;  %4359 = vmatprep.mubr.msk.f32.mxu0 %vm163_vm2, %v2639_v50 }
0x12a3   :  { %v3060_v52 = vpop.xlane.xlu1 %3059 }
0x12a7   :  { %v3063_v14 = vpop.xlane.xlu1 %3062 }
0x12a8   :  { %4594 = vrcp.f32 %v3063_v14 }
0x12a9   :  { %4596 = vrcp.f32 %v3060_v52 }
0x12ab   :  { %v2721_v54 = vpop.permute.xlu1 %2720 }
0x12ac   :  { %4357 = vmatprep.subr.mxu0 %v2721_v54 }
0x12ad   :  { %4358 = vmatpush3.msra.mxu0 %v2721_v54  ;;  %v3770_v54 = vld [vmem:[%s5214_s2 + $0x10] sm:$0xff] }
0x12ae   :  { %4360 = vmatmul.mubr.msk.f32.vlgmr.msra.gmra.mrb[22].mxu0 %vm163_vm2, %v2716_v25  ;;  %4362 = vmatprep.subr.mxu0 %v2805_v18 }
0x12af   :  { %4364 = vmatprep.mubr.msk.f32.mxu0 %vm163_vm2, %v5040_v53  ;;  %4363 = vmatpush3.msra.mxu0 %v2805_v18  ;;  %v3309_v47 = vpop.permute.xlu1 %3308 }
0x12b0   :  { %4377 = vmatprep.subr.mxu0 %v4634_v36 }
0x12b2   :  { %v4595_v5 = vpop.eup %4594 }
0x12b3   :  { %v3067_v55 = vmul.f32 %v4595_v5, %v4593_v39  ;;  %v4597_v56 = vpop.eup %4596  ;;  %v3307_v58 = vpop.permute.xlu1 %3306  ;;  %v3771_v5 = vld [vmem:[%s5214_s2 + $0x28] sm:$0xff] }
0x12b4   :  { %v3066_v53 = vmul.f32 %v4597_v56, %v4591_v27  ;;  %v3773_v56 = vld [vmem:[%s5214_s2 + $0x58] sm:$0xff] }
0x12b5   :  { %4385 = vmatmul.mubr.msk.f32.vlgmr.msra.gmra.mrb[38].mxu1 %vm163_vm2, %v3067_v55  ;;  %v3772_v55 = vld [vmem:[%s5214_s2 + $0x40] sm:$0xff] }
0x12b6   :  { %4393 = vmatpush3.xpose.msk.msra.mxu1 %vm163_vm2, %v3309_v47  ;;  %4365 = vmatmul.mubr.msk.f32.vlgmr.msra.gmra.mrb[22].mxu0 %vm163_vm2, %v5031_v46  ;;  %v4471_v47 = vpack.c.bf16 %v3771_v5, %v3770_v54 }
0x12b7   :  { %4378 = vmatpush3.msra.mxu0 %v3069_v24  ;;  %4394 = vmatprep.mubr.msk.f32.mxu1 %vm4635_vm1, %v4634_v36 }
0x12b8   :  { %4379 = vmatprep.mubr.msk.f32.mxu0 %vm4635_vm1, %v4634_v36  ;;  %4387 = vmatprep.subr.mxu0 %v3221_v57 }
0x12b9   :  { %4395 = vmatmul.mubr.msk.f32.vlgmr.msra.gmra.mrb[40].mxu1 %vm163_vm2, %v3307_v58  ;;  %4402 = vmatprep.subr.mxu1 %v4634_v36  ;;  %v3863_v58 = vld [vmem:[%s5215_s3 + $0x8] sm:$0xff] }
0x12ba   :  { %4380 = vmatmul.mubr.msk.f32.vlgmr.msra.gmra.mrb[24].mxu0 %vm163_vm2, %v3066_v53  ;;  %4404 = vmatprep.mubr.msk.f32.mxu1 %vm4635_vm1, %v4634_v36  ;;  %v3862_v53 = vld [vmem:[%s5215_s3] sm:$0xff] }
0x12bb   :  { %4388 = vmatpush3.msra.mxu0 %v3221_v57  ;;  %v4475_v57 = vpack.c.bf16 %v3773_v56, %v3772_v55 }
0x12bc   :  { %4397 = vmatprep.subr.mxu0 %v4634_v36 }
0x1388   :  { %v3216_v46 = vpop.f32.mrb[38].mxu1 }
0x1389   :  { %v4386_v59 = vpop.f32.mrb[39].mxu1 }
0x138a   :  { %v4479_v59 = vpack.c.bf16 %v3863_v58, %v3862_v53 }
0x138c   :  { %v3380_v60 = vpop.f32.mrb[40].mxu1 }
0x138d   :  { %v3462_v61 = vmul.f32 0.35355338, %v3380_v60  ;;  %v3140_v62 = vpop.f32.mrb[24].mxu0  ;;  %v4396_v63 = vpop.f32.mrb[41].mxu1 }
0x138e   :  { %v4381_v2 = vpop.f32.mrb[25].mxu0  ;;  %4389 = vmatprep.mubr.msk.f32.mxu0 %vm163_vm2, %v3140_v62  ;;  %v3867_v62 = vld [vmem:[%s5215_s3 + $0x28] sm:$0xff] }
0x138f   :  { %4390 = vmatmul.mubr.msk.f32.vlgmr.msra.gmra.mrb[22].mxu0 %vm163_vm2, %v3216_v46  ;;  %v3464_v3 = vsel %vm163_vm2, %v3462_v61, -inf  ;;  %v3864_v46 = vld [vmem:[%s5215_s3 + $0x10] sm:$0xff] }
0x1390   :  { %4398 = vmatpush3.xpose.msk.msra.mxu0 %vm163_vm2, %v3387_v16  ;;  %3465 = vmax.xlane.f32.xlu1 %v3464_v3  ;;  %v3865_v16 = vld [vmem:[%s5215_s3 + $0x18] sm:$0xff] }
0x1391   :  { %4399 = vmatprep.mubr.msk.f32.mxu0 %vm4635_vm1, %v4634_v36  ;;  %4407 = vmatprep.subr.mxu0 %v4634_v36  ;;  %v4483_v60 = vpack.c.bf16 %v3865_v16, %v3864_v46 }
0x1393   :  { %4400 = vmatmul.mubr.msk.f32.vlgmr.msra.gmra.mrb[26].mxu0 %vm163_vm2, %v3385_v4 }
0x1394   :  { %4409 = vmatprep.mubr.msk.f32.mxu0 %vm4635_vm1, %v4634_v36 }
0x13a1   :  { %3486 = vrot.lane.b32.xlu1 %v5009_v37, %s4646_s20 }
0x13a5   :  { %3638 = vrot.lane.b32.xlu1 %v4932_v17, %s4643_s17 }
0x141d   :  { %v3466_v41 = vpop.xlane.xlu1 %3465 }
0x141e   :  { %v3470_v7 = vsub.f32 %v3462_v61, %v3466_v41  ;;  %v3866_v61 = vld [vmem:[%s5215_s3 + $0x20] sm:$0xff] }
0x141f   :  { %v4487_v63 = vpack.c.bf16 %v3867_v62, %v3866_v61 }
0x1420   :  { %v3472_v8 = vmul.f32 1.442695, %v3470_v7 }
0x1421   :  { %v3487_v6 = vpop.permute.xlu1 %3486 }
0x1422   :  { %4403 = vmatpush3.msra.mxu1 %v3487_v6  ;;  %4598 = vpow2.f32 %v3472_v8 }
0x1423   :  { %4472 = vmatprep.subr.bf16.mxu1 %v4471_v47 }
0x1425   :  { %v3639_v26 = vpop.permute.xlu1 %3638 }
0x142c   :  { %v4599_v21 = vpop.eup %4598 }
0x142d   :  { %v3476_v36 = vsel %vm163_vm2, %v4599_v21, 0.0 }
0x1466   :  { %v3458_v9 = vpop.f32.mrb[26].mxu0 }
0x1467   :  { %v3463_v10 = vmul.f32 0.35355338, %v3458_v9  ;;  %v4401_v11 = vpop.f32.mrb[27].mxu0  ;;  %v4054_v9 = vld [vmem:[%s5216_s4 + $0x2] ss:$0 sm:$0xff] }
0x1469   :  { %v3467_v20 = vsel %vm163_vm2, %v3463_v10, -inf }
0x146a   :  { %3468 = vmax.xlane.f32.xlu0 %v3467_v20 }
0x146e   :  { %3477 = vadd.xlane.f32.xlu0 %v3476_v36 }
0x14f7   :  { %v3469_v37 = vpop.xlane.xlu0 %3468 }
0x14f8   :  { %v3471_v0 = vsub.f32 %v3463_v10, %v3469_v37 }
0x14fa   :  { %v3474_v23 = vmul.f32 1.442695, %v3471_v0 }
0x14fb   :  { %v3478_v17 = vpop.xlane.xlu0 %3477 }
0x14fc   :  { %4600 = vpow2.f32 %v3474_v23 }
0x14fd   :  { %4602 = vrcp.f32 %v3478_v17  ;;  %v3868_v17 = vld [vmem:[%s5215_s3 + $0x30] sm:$0xff] }
0x1506   :  { %v4601_v18 = vpop.eup %4600 }
0x1507   :  { %v4603_v1 = vpop.eup %4602  ;;  %v3479_v15 = vsel %vm163_vm2, %v4601_v18, 0.0 }
0x1508   :  { %v3484_v24 = vmul.f32 %v4603_v1, %v4599_v21  ;;  %3480 = vadd.xlane.f32.xlu0 %v3479_v15  ;;  %v4055_v21 = vld [vmem:[%s5216_s4 + $0x3] ss:$0 sm:$0xff]  ;;  %v4056_v15 = vld [vmem:[%s5216_s4 + $0x9] ss:$0 sm:$0xff] }
0x150a   :  { %4405 = vmatmul.mubr.msk.f32.vlgmr.msra.gmra.mrb[42].mxu1 %vm163_vm2, %v3484_v24 }
0x150b   :  { %4474 = vmatpush3.bf16.msra.mxu1 %v4471_v47 }
0x150c   :  { %4476 = vmatprep.subr.bf16.mxu1 %v4475_v57 }
0x150f   :  { %4478 = vmatpush3.bf16.msra.mxu1 %v4475_v57 }
0x151e   :  { %3562 = vrot.lane.b32.xlu0 %v5007_v34, %s4646_s20  ;;  %v4053_v34 = vld [vmem:[%s5216_s4 + $0x8] ss:$0 sm:$0xff] }
0x1595   :  { %v3481_v25 = vpop.xlane.xlu0 %3480 }
0x1596   :  { %4604 = vrcp.f32 %v3481_v25 }
0x1599   :  { %v3563_v28 = vpop.permute.xlu0 %3562 }
0x159a   :  { %4408 = vmatpush3.msra.mxu0 %v3563_v28 }
0x159b   :  { %4412 = vmatprep.subr.mxu0 %v3639_v26 }
0x15a0   :  { %v4605_v13 = vpop.eup %4604 }
0x15a1   :  { %v3485_v30 = vmul.f32 %v4605_v13, %v4601_v18  ;;  %v3869_v18 = vld [vmem:[%s5215_s3 + $0x38] sm:$0xff]  ;;  %s4648_s3 = smov [#allocation2]  }
0x15a2   :  { %v4491_v1 = vpack.c.bf16 %v3869_v18, %v3868_v17  ;;  %s3966_s19 = sshll.u32 %s4648_s3, 4  ;;  %s3967_s19 = int_to_ptr.vmem [resolvable:$true] %s3966_s19 }
0x15a3   :  { %4410 = vmatmul.mubr.msk.f32.vlgmr.msra.gmra.mrb[28].mxu0 %vm163_vm2, %v3485_v30  ;;  %s4610_s20 = scalar_lea.vmem %s3967_s19, 256  ;;  %p4615_p1 = scmp.lt.s32.totalorder %s3967_s19, %s3967_s19 }
0x15a4   :  { %4413 = vmatpush3.msra.mxu0 %v3639_v26  ;;  %p4611_p0 = scmp.ne.s32.totalorder %s3967_s19, %s4610_s20  ;;  %p4616_p2 = scmp.lt.s32.totalorder %s4610_s20, %s4610_s20 }
0x15a5   :  { %4480 = vmatprep.subr.bf16.mxu0 %v4479_v59 }
0x15a6   :  { %p4617_p3 = por %p4616_p2, %p4615_p1 }
0x15a8   :  { %p4618_p4 = pnand %p4617_p3, %p4611_p0 }
0x15dd   :  { %v3558_v31 = vpop.f32.mrb[42].mxu1 }
0x15de   :  { %v4406_v48 = vpop.f32.mrb[43].mxu1  ;;  %4414 = vmatprep.mubr.msk.f32.mxu0 %vm163_vm2, %v3558_v31  ;;  %v4059_v31 = vld [vmem:[%s5216_s4 + $0xa] ss:$0 sm:$0xff] }
0x1676   :  { %v3634_v32 = vpop.f32.mrb[28].mxu0 }
0x1677   :  { %v4411_v22 = vpop.f32.mrb[29].mxu0  ;;  %4415 = vmatmul.mubr.msk.f32.vlgmr.msra.gmra.mrb[22].mxu0 %vm163_vm2, %v3634_v32 }
0x1678   :  { %4482 = vmatpush3.bf16.msra.mxu0 %v4479_v59 }
0x1679   :  { %4484 = vmatprep.subr.bf16.mxu0 %v4483_v60 }
0x167c   :  { %4486 = vmatpush3.bf16.msra.mxu0 %v4483_v60 }
0x167d   :  { %4488 = vmatprep.subr.bf16.mxu0 %v4487_v63 }
0x1680   :  { %4490 = vmatpush3.bf16.msra.mxu0 %v4487_v63 }
0x1681   :  { %4492 = vmatprep.subr.bf16.mxu0 %v4491_v1 }
0x1684   :  { %4494 = vmatpush3.bf16.msra.mxu0 %v4491_v1 }
0x174a   :  { %v4416_v33 = vpop.f32.mrb[22].mxu0 }
0x174b   :  { %v3729_v35 = vadd.f32 %v4416_v33, %v4053_v34  ;;  %v3713_v38 = vpop.f32.mrb[23].mxu0 }
0x174c   :  { %v3728_v40 = vadd.f32 %v4053_v34, %v3713_v38 }
0x174d   :  { %v5133_v42 = vadd.f32 %v3729_v35, %v4887_v12 }
0x174e   :  { %v5136_v43 = vadd.f32 %v3728_v40, %v4861_v19 }
0x174f   :  { %v3735_v44 = vsel %vm29_vm0, %v5133_v42, 0.0 }
0x1750   :  { %3736 = vadd.xlane.f32.xlu0 %v3735_v44  ;;  %v3732_v45 = vsel %vm29_vm0, %v5136_v43, 0.0 }
0x1751   :  { %3733 = vadd.xlane.f32.xlu1 %v3732_v45 }
0x17dd   :  { %v3737_v27 = vpop.xlane.xlu0 %3736 }
0x17de   :  { %v3739_v29 = vmul.f32 0.03125, %v3737_v27  ;;  %v3734_v39 = vpop.xlane.xlu1 %3733 }
0x17df   :  { %v3738_v49 = vmul.f32 0.03125, %v3734_v39 }
0x17e0   :  { %v3741_v50 = vsub.f32 %v5133_v42, %v3739_v29 }
0x17e1   :  { %v3740_v12 = vsub.f32 %v5136_v43, %v3738_v49 }
0x17e2   :  { %v3743_v51 = vmul.f32 %v3741_v50, %v3741_v50 }
0x17e3   :  { %v3742_v52 = vmul.f32 %v3740_v12, %v3740_v12 }
0x17e4   :  { %v3747_v19 = vsel %vm29_vm0, %v3743_v51, 0.0 }
0x17e5   :  { %3748 = vadd.xlane.f32.xlu1 %v3747_v19  ;;  %v3744_v14 = vsel %vm29_vm0, %v3742_v52, 0.0 }
0x17e6   :  { %3745 = vadd.xlane.f32.xlu0 %v3744_v14 }
0x1872   :  { %v3749_v2 = vpop.xlane.xlu1 %3748 }
0x1873   :  { %v3751_v3 = vmul.f32 0.03125, %v3749_v2  ;;  %v3746_v4 = vpop.xlane.xlu0 %3745 }
0x1874   :  { %v3750_v41 = vmul.f32 0.03125, %v3746_v4 }
0x1875   :  { %v3753_v6 = vadd.f32 1e-05, %v3751_v3 }
0x1876   :  { %v3752_v7 = vadd.f32 1e-05, %v3750_v41 }
0x1877   :  { %4606 = vrsqrt.f32 %v3753_v6 }
0x1878   :  { %4608 = vrsqrt.f32 %v3752_v7 }
0x1881   :  { %v4607_v8 = vpop.eup %4606 }
0x1882   :  { %v4609_v10 = vpop.eup %4608  ;;  %v3757_v11 = vmul.f32 %v4607_v8, %v3741_v50 }
0x1883   :  { %v3756_v20 = vmul.f32 %v4609_v10, %v3740_v12 }
0x1884   :  { %v3763_v36 = vmul.f32 %v4054_v9, %v3757_v11 }
0x1885   :  { %v3762_v37 = vmul.f32 %v4054_v9, %v3756_v20 }
0x1886   :  { %v3769_v23 = vadd.f32 %v4055_v21, %v3763_v36 }
0x1887   :  { %v3768_v0 = vadd.f32 %v4055_v21, %v3762_v37 }
0x1889   :  { %4425 = vmatprep.mubr.msk.f32.mxu1 %vm29_vm0, %v3768_v0 }
0x188a   :  { %4426 = vmatmul.mubr.msk.f32.vlgmr.msra.gmra.mrb[44].mxu1 %vm29_vm0, %v3769_v23 }
0x195d   :  { %v4427_v24 = vpop.f32.mrb[44].mxu1 }
0x195e   :  { %v3857_v25 = vadd.f32 %v4427_v24, %v4056_v15  ;;  %v3851_v26 = vpop.f32.mrb[45].mxu1 }
0x195f   :  { %v3852_v28 = vadd.f32 %v4056_v15, %v3851_v26 }
0x1960   :  { %v3861_v30 = vmax.f32 %v3857_v25, 0.0 }
0x1961   :  { %v3860_v13 = vmax.f32 %v3852_v28, 0.0 }
0x1963   :  { %4444 = vmatprep.mubr.msk.f32.mxu0 %vm3875_vm3, %v3860_v13 }
0x1964   :  { %4445 = vmatmul.mubr.msk.f32.vlgmr.msra.gmra.mrb[30].mxu0 %vm3875_vm3, %v3861_v30 }
0x1a37   :  { %v4446_v48 = vpop.f32.mrb[30].mxu0 }
0x1a38   :  { %v3954_v32 = vadd.f32 %v4446_v48, %v4059_v31  ;;  %v3948_v22 = vpop.f32.mrb[31].mxu0 }
0x1a39   :  { %v3949_v34 = vadd.f32 %v4059_v31, %v3948_v22 }
0x1a3a   :  { %v3958_v33 = vadd.f32 %v3954_v32, %v5133_v42 }
0x1a3b   :  { %v3957_v35 = vadd.f32 %v3949_v34, %v5136_v43 }
0x1a3c   :  { %3960 = vst.msk [vmem:[#allocation2 + $0x8] sm:$0xff] %vm29_vm0, %v3958_v33 }
0x1a3d   :  { %3959 = vst.msk [vmem:[#allocation2] sm:$0xff] %vm29_vm0, %v3957_v35 }
0x1a3e   :  { %4621 = shalt.err (!%p4618_p4)
}
0x1a3f   :  { %s4622_s1 = scalar_lea.hbm %s5217_s5, 256 }
0x1a40   :  { %p4623_p5 = scmp.ne.s32.totalorder %s5217_s5, %s4622_s1  ;;  %p4626_p6 = scmp.lt.u32.totalorder %s4622_s1, %s5217_s5 }
0x1a42   :  { %p4628_p7 = pnand %p4626_p6, %p4623_p5 }
0x1a44   :  { %4631 = shalt.err (!%p4628_p7)
}
0x1a45   :  { %s4649_s25 = smov 128   ;;  %s4650_s26 = smov 8  }
0x1a46   :  { %3972 = dma.vmem_to_hbm [thread:$0]  %s3967_s19, 256, %s5217_s5, [#allocation3], %s4649_s25, %s4649_s25, %s4650_s26  }
0x1a47   :  { %4632 = dma.done.wait [#allocation3], 256  }
0x1a48   :  { %4633 = vsyncadd [#allocation3], 4294967040 }
0x1a49   :  { %3976 = vsyncpa [#allocation3], 1 }

</bundles_post_ra>
